<compile_context>
chip_gen: v6e
topology: v6e:2x2x1
jax: 0.10.0
libtpu: 0.0.40
codegen_flags: <defaults>
</compile_context>

<pallas_src>
import functools

import jax
import jax.numpy as jnp
import numpy as np
from jax import lax
from jax.experimental import pallas as pl
from jax.experimental.pallas import tpu as pltpu

LANE = 128
MATMUL_DTYPE = jnp.bfloat16   # MXU-native on v5e/v6e/v7x (f32 path is emulated)
INTER_DTYPE = jnp.bfloat16    # inter-layer conv outputs in HBM (halves HBM traffic)


def _itemsize(dt):
    return np.dtype(dt).itemsize


def _round_up(x, m):
    return (x + m - 1) // m * m


def _pad_channels(c):
    # C < 128: keep the true channel count (blocks use the full-dim exemption
    # of the (8,128) rule) -- padding tiny channel counts to 128 would inflate
    # HBM traffic and MXU work 16-32x.  C >= 128: lane-dense multiple of 128.
    return c if c <= LANE else _round_up(c, LANE)


def _vmem_limit_bytes():
    # Generation-aware scoped-VMEM limit: physical capacity minus headroom
    # (64 MiB physical on v7x, 128 MiB on v5e/v6e), clamped to a sane range.
    cap = 64 * 1024 * 1024
    try:
        info = pltpu.get_tpu_info()
        cap = int(getattr(info, "vmem_capacity_bytes", cap) or cap)
    except Exception:
        pass
    return int(max(32 * 1024 * 1024, min(cap - 8 * 1024 * 1024, 120 * 1024 * 1024)))


def _largest_divisor_leq(n, cap):
    if cap >= n:
        return n
    best, i = 1, 1
    while i * i <= n:
        if n % i == 0:
            for d in (i, n // i):
                if d <= cap and d > best:
                    best = d
        i += 1
    return best


def _conv_tile_rows(H, W, cin, cout, x_itemsize, vmem_limit):
    """Largest divisor of H whose per-step footprint fits ~70% of the VMEM limit."""
    mm = _itemsize(MATMUL_DTYPE)
    yb = _itemsize(INTER_DTYPE)
    budget = int(vmem_limit * 0.7)
    fixed = 2 * 3 * 3 * cin * cout * mm          # double-buffered weight block
    fixed += 2 * 2 * W * cin * x_itemsize        # 1-row top/bot halo blocks (x2 buffers)
    fixed += 64 * 1024                           # bias / scale / shift / stats blocks
    per_row = W * (2 * cin * x_itemsize          # mid input block (x2 buffers)
                   + 2 * cout * yb               # conv output block (x2 buffers)
                   + 3 * cin * mm                # xcat staging scratch
                   + 2 * cout * 4)               # f32 acc + stats live values
    max_rows = max(1, (budget - fixed) // per_row)
    return _largest_divisor_leq(H, max_rows)


def _bn_tile_rows(NH, W, C, y_itemsize, vmem_limit):
    budget = int(vmem_limit * 0.6)
    per_row = W * C * (2 * y_itemsize + 2 * 4)   # x2 in buffers + x2 f32 out buffers
    max_rows = max(1, budget // per_row)
    return _largest_divisor_leq(NH, max_rows)


# ----------------------------------------------------------------------------
# Pass 1: conv(3x3, pad 1) + bias, plus per-channel sum / sum-of-squares stats.
# Optionally applies the *previous* layer's BN+ReLU to the input on the fly.
# ----------------------------------------------------------------------------
def _conv_stats_kernel(x_top_ref, x_mid_ref, x_bot_ref, w_ref, b_ref,
                       sc_ref, sh_ref, y_ref, stats_ref, xcat_ref,
                       *, tr, n_rb, apply_input_act, mm_dtype):
    j = pl.program_id(2)                                   # inner "arbitrary" axis
    rb = pl.program_id(1) * pl.num_programs(2) + j         # global row-block index
    W = x_mid_ref.shape[2]
    Cin = x_mid_ref.shape[3]
    Cout = y_ref.shape[3]

    col = lax.broadcasted_iota(jnp.int32, (1, W, 1), 1)

    def prep(v, row_valid=None):
        # v: (r, W, Cin) input rows; f32 math for activation/masking.
        v = v.astype(jnp.float32)
        if apply_input_act:                                # previous layer's BN + ReLU
            v = jnp.maximum(v * sc_ref[...] + sh_ref[...], 0.0)
        if row_valid is not None:                          # conv zero padding (rows)
            v = jnp.where(row_valid, v, 0.0)
        # Column taps via XLU rolls (np.roll semantics) + edge masks
        # (conv zero padding in W) -- no misaligned sublane slices.
        xm1 = jnp.where(col >= 1, pltpu.roll(v, shift=1, axis=1), 0.0)          # x-1 tap
        xp1 = jnp.where(col < W - 1, pltpu.roll(v, shift=W - 1, axis=1), 0.0)   # x+1 tap
        # K layout matches w.reshape(3, 3*Cin, Cout): index = kw*Cin + c.
        return jnp.concatenate([xm1, v, xp1], axis=2).astype(mm_dtype)

    # Stage the (tr+2, W, 3*Cin) tap-concatenated rows ONCE per tile; the three
    # dy taps below are then free leading-axis slices of this scratch.
    xcat_ref[0:1] = prep(x_top_ref[0], rb > 0)
    xcat_ref[1:tr + 1] = prep(x_mid_ref[0])
    xcat_ref[tr + 1:tr + 2] = prep(x_bot_ref[0], rb < n_rb - 1)

    # 3 MXU matmuls (K = 3*Cin), accumulated as values (no VMEM accumulator).
    acc = jnp.dot(xcat_ref[0:tr].reshape(tr * W, 3 * Cin), w_ref[0],
                  preferred_element_type=jnp.float32)
    acc = acc + jnp.dot(xcat_ref[1:tr + 1].reshape(tr * W, 3 * Cin), w_ref[1],
                        preferred_element_type=jnp.float32)
    acc = acc + jnp.dot(xcat_ref[2:tr + 2].reshape(tr * W, 3 * Cin), w_ref[2],
                        preferred_element_type=jnp.float32)
    acc = acc + b_ref[...]                                 # (tr*W, Cout) f32

    y_ref[...] = acc.reshape(1, tr, W, Cout).astype(y_ref.dtype)

    # Per-channel sum / sum-of-squares from the f32 accumulator (BN statistics
    # stay f32-exact even though y is written back in bf16).  The stats block
    # is revisited across the inner row axis -> global per-(n, group) sums.
    s = jnp.sum(acc, axis=0, keepdims=True)
    ss = jnp.sum(acc * acc, axis=0, keepdims=True)
    tile_stats = jnp.concatenate([s, ss], axis=0).reshape(1, 1, 2, Cout)

    @pl.when(j == 0)
    def _():
        stats_ref[...] = jnp.zeros_like(stats_ref)

    stats_ref[...] += tile_stats


def conv_stats_pass(x, wd, b, in_scale, in_shift, *, apply_input_act,
                    vmem_limit, tile_rows=None):
    """x: (N,H,W,Cin) -> (conv_out (N,H,W,Cout) bf16, stats (N,G,2,Cout) f32)."""
    N, H, W, Cin = x.shape
    Cout = wd.shape[-1]
    if tile_rows is None:
        tile_rows = _conv_tile_rows(H, W, Cin, Cout, _itemsize(x.dtype), vmem_limit)
    tr = tile_rows
    assert H % tr == 0, (H, tr)
    n_rb = H // tr
    # Row-group axis marked "parallel" so v7x's two TensorCores split the rows
    # even at batch size 1 (harmless on single-TC v5e/v6e).
    G = 2 if n_rb % 2 == 0 else 1
    J = n_rb // G

    row_top = lambda n, g, j: (n, jnp.maximum((g * J + j) * tr - 1, 0), 0, 0)
    row_mid = lambda n, g, j: (n, g * J + j, 0, 0)
    row_bot = lambda n, g, j: (n, jnp.minimum((g * J + j) * tr + tr, H - 1), 0, 0)

    kernel = functools.partial(_conv_stats_kernel, tr=tr, n_rb=n_rb,
                               apply_input_act=apply_input_act,
                               mm_dtype=MATMUL_DTYPE)
    y, stats = pl.pallas_call(
        kernel,
        out_shape=(jax.ShapeDtypeStruct((N, H, W, Cout), INTER_DTYPE),
                   jax.ShapeDtypeStruct((N, G, 2, Cout), jnp.float32)),
        grid=(N, G, J),
        in_specs=[
            pl.BlockSpec((1, 1, W, Cin), row_top),                       # halo row above
            pl.BlockSpec((1, tr, W, Cin), row_mid),                      # tile rows
            pl.BlockSpec((1, 1, W, Cin), row_bot),                       # halo row below
            pl.BlockSpec((3, 3 * Cin, Cout), lambda n, g, j: (0, 0, 0)),  # weights (resident)
            pl.BlockSpec((1, Cout), lambda n, g, j: (0, 0)),             # bias
            pl.BlockSpec((1, Cin), lambda n, g, j: (0, 0)),              # prev-layer BN scale
            pl.BlockSpec((1, Cin), lambda n, g, j: (0, 0)),              # prev-layer BN shift
        ],
        out_specs=(
            pl.BlockSpec((1, tr, W, Cout), lambda n, g, j: (n, g * J + j, 0, 0)),
            pl.BlockSpec((1, 1, 2, Cout), lambda n, g, j: (n, g, 0, 0)),  # revisited over j
        ),
        scratch_shapes=[
            pltpu.VMEM((tr + 2, W, 3 * Cin), MATMUL_DTYPE),   # staged tap-concat rows
        ],
        compiler_params=pltpu.CompilerParams(
            dimension_semantics=("parallel", "parallel", "arbitrary"),
            vmem_limit_bytes=vmem_limit),
    )(x, x, x, wd, b, in_scale, in_shift)
    return y, stats


# ----------------------------------------------------------------------------
# Pass 2: elementwise BN (precomputed scale/shift) + ReLU with its own, large
# tiling on a (N*H, W, C) view (purely HBM-bound).
# ----------------------------------------------------------------------------
def _bn_relu_kernel(y_ref, sc_ref, sh_ref, o_ref):
    v = y_ref[...].astype(jnp.float32)
    o_ref[...] = jnp.maximum(v * sc_ref[...] + sh_ref[...], 0.0)


def bn_relu_pass(y, scale, shift, *, vmem_limit):
    N, H, W, C = y.shape
    NH = N * H
    y3 = y.reshape(NH, W, C)
    tr = _bn_tile_rows(NH, W, C, _itemsize(y.dtype), vmem_limit)
    nblk = NH // tr
    out = pl.pallas_call(
        _bn_relu_kernel,
        out_shape=jax.ShapeDtypeStruct((NH, W, C), jnp.float32),
        grid=(nblk,),
        in_specs=[
            pl.BlockSpec((tr, W, C), lambda i: (i, 0, 0)),
            pl.BlockSpec((1, C), lambda i: (0, 0)),
            pl.BlockSpec((1, C), lambda i: (0, 0)),
        ],
        out_specs=pl.BlockSpec((tr, W, C), lambda i: (i, 0, 0)),
        compiler_params=pltpu.CompilerParams(
            dimension_semantics=("parallel",),
            vmem_limit_bytes=vmem_limit),
    )(y3, scale, shift)
    return out.reshape(N, H, W, C)


# ----------------------------------------------------------------------------
# Parameter prep / BN scale-shift (tiny O(C) host-graph math).
# ----------------------------------------------------------------------------
def _prep_layer(w, b, gamma, beta, cpin, cpout):
    """Optionally channel-pad; weights -> (3, 3*Cin_pad, Cout_pad) in bf16."""
    _, _, cin, cout = w.shape
    wp = jnp.zeros((3, 3, cpin, cpout), jnp.float32).at[:, :, :cin, :cout].set(w)
    wd = wp.reshape(3, 3 * cpin, cpout).astype(MATMUL_DTYPE)
    bp = jnp.zeros((1, cpout), jnp.float32).at[0, :cout].set(b)
    gp = jnp.ones((cpout,), jnp.float32).at[:cout].set(gamma)
    bep = jnp.zeros((cpout,), jnp.float32).at[:cout].set(beta)
    return wd, bp, gp, bep


def _bn_scale_shift(stats, gamma_p, beta_p, count, eps):
    """stats: (N, G, 2, C) [sum; sumsq] -> per-channel scale/shift, shape (1, C).

    Variance via E[x^2] - E[x]^2 in f32; fine at these counts (a mean-shifted
    accumulation would be needed only if |mean| >> std at very large N*H*W).
    """
    total = jnp.sum(stats, axis=(0, 1))                    # (2, C)
    mean = total[0] / count
    var = jnp.maximum(total[1] / count - mean * mean, 0.0)  # biased (train-mode) variance
    scale = gamma_p * jax.lax.rsqrt(var + eps)
    shift = beta_p - mean * scale
    return scale.reshape(1, -1), shift.reshape(1, -1)


# ----------------------------------------------------------------------------
# Full module forward (NCHW in / NCHW out, matching the PyTorch spec).
# ----------------------------------------------------------------------------
@functools.partial(jax.jit, static_argnames=("tile_rows",))
def conv3x3_forward(x_nchw, params, tile_rows=None):
    eps = 1e-5
    N, Cin, H, W = x_nchw.shape
    Cout = params["w1"].shape[-1]
    cpin = _pad_channels(Cin)
    cpout = _pad_channels(Cout)
    count = N * H * W
    vmem_limit = _vmem_limit_bytes()

    # NCHW -> NHWC; channels only padded when >= 128 (lane-dense case).
    x = jnp.transpose(x_nchw, (0, 2, 3, 1))
    if cpin != Cin:
        x = jnp.pad(x, ((0, 0), (0, 0), (0, 0), (0, cpin - Cin)))

    w1, b1, g1, be1 = _prep_layer(params["w1"], params["b1"],
                                  params["g1"], params["be1"], cpin, cpout)
    w2, b2, g2, be2 = _prep_layer(params["w2"], params["b2"],
                                  params["g2"], params["be2"], cpout, cpout)

    ones_in = jnp.ones((1, cpin), jnp.float32)
    zeros_in = jnp.zeros((1, cpin), jnp.float32)

    # Layer 1: conv1 + global sum/sumsq stats.
    y1, st1 = conv_stats_pass(x, w1, b1, ones_in, zeros_in,
                              apply_input_act=False, vmem_limit=vmem_limit,
                              tile_rows=tile_rows)
    sc1, sh1 = _bn_scale_shift(st1, g1, be1, count, eps)

    # Layer 2: BN1+ReLU fused into the conv2 input load, then conv2 + stats.
    y2, st2 = conv_stats_pass(y1, w2, b2, sc1, sh1,
                              apply_input_act=True, vmem_limit=vmem_limit,
                              tile_rows=tile_rows)
    sc2, sh2 = _bn_scale_shift(st2, g2, be2, count, eps)

    # Final BN2 + ReLU (only standalone normalize pass in the whole module).
    out = bn_relu_pass(y2, sc2, sh2, vmem_limit=vmem_limit)

    out = out[..., :Cout]                                  # drop channel padding (if any)
    return jnp.transpose(out, (0, 3, 1, 2))                # back to NCHW


def init_params(key, in_feat, out_feat):
    """Deterministic PyTorch-shaped params (conv weights in HWIO (3,3,Cin,Cout))."""
    def conv_init(k, cin, cout):
        bound = 1.0 / jnp.sqrt(cin * 9.0)
        kw, kb = jax.random.split(k)
        w = jax.random.uniform(kw, (3, 3, cin, cout), jnp.float32, -bound, bound)
        b = jax.random.uniform(kb, (cout,), jnp.float32, -bound, bound)
        return w, b

    k1, k2 = jax.random.split(key)
    w1, b1 = conv_init(k1, in_feat, out_feat)
    w2, b2 = conv_init(k2, out_feat, out_feat)
    return dict(
        w1=w1, b1=b1, g1=jnp.ones((out_feat,), jnp.float32),
        be1=jnp.zeros((out_feat,), jnp.float32),
        w2=w2, b2=b2, g2=jnp.ones((out_feat,), jnp.float32),
        be2=jnp.zeros((out_feat,), jnp.float32),
    )


def _reference_forward(x_nchw, params, eps=1e-5):
    """Pure-JAX reference (lax conv + training-mode BN + ReLU), f32."""
    def block(x, w, b, gamma, beta):
        y = jax.lax.conv_general_dilated(
            x, w, window_strides=(1, 1), padding="SAME",
            dimension_numbers=("NCHW", "HWIO", "NCHW"),
        ) + b.reshape(1, -1, 1, 1)
        mean = jnp.mean(y, axis=(0, 2, 3), keepdims=True)
        var = jnp.mean((y - mean) ** 2, axis=(0, 2, 3), keepdims=True)
        y = (y - mean) * jax.lax.rsqrt(var + eps)
        y = y * gamma.reshape(1, -1, 1, 1) + beta.reshape(1, -1, 1, 1)
        return jnp.maximum(y, 0.0)

    y = block(x_nchw, params["w1"], params["b1"], params["g1"], params["be1"])
    y = block(y, params["w2"], params["b2"], params["g2"], params["be2"])
    return y


if __name__ == "__main__":
    key = jax.random.PRNGKey(0)
    kx, kp = jax.random.split(key)

    N, Cin, Cout, H, W = 2, 4, 8, 16, 16
    x = jax.random.normal(kx, (N, Cin, H, W), jnp.float32)
    params = init_params(kp, Cin, Cout)

    # tile_rows=4 -> 4 row blocks per image: exercises the halo indexing, the
    # 2-way row-group ("parallel") split and the revisited stats accumulator.
    out = conv3x3_forward(x, params, tile_rows=4)
    out = jax.block_until_ready(out)
    assert out.shape == (N, Cout, H, W), out.shape

    ref = _reference_forward(x, params)
    # bf16 MXU operands + bf16 inter-layer tensors -> loosened tolerance.
    if not jnp.allclose(out, ref, atol=5e-2, rtol=5e-2):
        err = float(jnp.max(jnp.abs(out - ref)))
        raise AssertionError(f"Pallas kernel mismatch vs JAX reference (max abs err={err})")

    print("KERNEL_OK")
</pallas_src>

<mosaic_0001>
module attributes {stable_mosaic.version = 11 : i64} {
  func.func @_bn_relu_kernel(%arg0: i32, %arg1: memref<32x16x8xbf16, #tpu.memory_space<vmem>>, %arg2: memref<1x8xf32, #tpu.memory_space<vmem>>, %arg3: memref<1x8xf32, #tpu.memory_space<vmem>>, %arg4: memref<32x16x8xf32, #tpu.memory_space<vmem>>) attributes {dimension_semantics = [#tpu.dimension_semantics<parallel>], iteration_bounds = array<i64: 1>, scalar_prefetch = 0 : i64, scratch_operands = 0 : i64, tpu.core_type = #tpu.core_type<tc>, window_params = [{transform_indices = @transform_0, window_bounds = array<i64: 32, 16, 8>}, {pipeline_mode = #tpu.pipeline_mode<synchronous>, transform_indices = @transform_1, window_bounds = array<i64: 1, 8>}, {pipeline_mode = #tpu.pipeline_mode<synchronous>, transform_indices = @transform_2, window_bounds = array<i64: 1, 8>}, {transform_indices = @transform_3, window_bounds = array<i64: 32, 16, 8>}]} {
    %c0 = arith.constant 0 : index
    %c0_0 = arith.constant 0 : index
    %c0_1 = arith.constant 0 : index
    %0 = vector.load %arg1[%c0, %c0_0, %c0_1] : memref<32x16x8xbf16, #tpu.memory_space<vmem>>, vector<32x16x8xbf16>
    %1 = arith.extf %0 : vector<32x16x8xbf16> to vector<32x16x8xf32>
    %c0_2 = arith.constant 0 : index
    %c0_3 = arith.constant 0 : index
    %2 = vector.load %arg2[%c0_2, %c0_3] : memref<1x8xf32, #tpu.memory_space<vmem>>, vector<1x8xf32>
    %3 = vector.shape_cast %2 : vector<1x8xf32> to vector<1x1x8xf32>
    %4 = vector.broadcast %3 : vector<1x1x8xf32> to vector<32x16x8xf32>
    %5 = arith.mulf %1, %4 : vector<32x16x8xf32>
    %c0_4 = arith.constant 0 : index
    %c0_5 = arith.constant 0 : index
    %6 = vector.load %arg3[%c0_4, %c0_5] : memref<1x8xf32, #tpu.memory_space<vmem>>, vector<1x8xf32>
    %7 = vector.shape_cast %6 : vector<1x8xf32> to vector<1x1x8xf32>
    %8 = vector.broadcast %7 : vector<1x1x8xf32> to vector<32x16x8xf32>
    %9 = arith.addf %5, %8 : vector<32x16x8xf32>
    %cst = arith.constant 0.000000e+00 : f32
    %10 = vector.broadcast %cst : f32 to vector<32x16x8xf32>
    %11 = arith.maximumf %9, %10 : vector<32x16x8xf32>
    %c0_6 = arith.constant 0 : index
    %c0_7 = arith.constant 0 : index
    %c0_8 = arith.constant 0 : index
    %12 = vector.load %arg4[%c0_6, %c0_7, %c0_8] : memref<32x16x8xf32, #tpu.memory_space<vmem>>, vector<32x16x8xf32>
    tpu.vector_store %arg4[%c0_6, %c0_7, %c0_8], %11 {strides = array<i32>} : memref<32x16x8xf32, #tpu.memory_space<vmem>>, vector<32x16x8xf32>,
    return
  }
  func.func @transform_0(%arg0: i32) -> (i32, i32, i32) {
    %c0_i32 = arith.constant 0 : i32
    %c0_i32_0 = arith.constant 0 : i32
    %c0_i32_1 = arith.constant 0 : i32
    return %arg0, %c0_i32, %c0_i32_0 : i32, i32, i32
  }
  func.func @transform_1(%arg0: i32) -> (i32, i32) {
    %c0_i32 = arith.constant 0 : i32
    %c0_i32_0 = arith.constant 0 : i32
    %c0_i32_1 = arith.constant 0 : i32
    return %c0_i32, %c0_i32_0 : i32, i32
  }
  func.func @transform_2(%arg0: i32) -> (i32, i32) {
    %c0_i32 = arith.constant 0 : i32
    %c0_i32_0 = arith.constant 0 : i32
    %c0_i32_1 = arith.constant 0 : i32
    return %c0_i32, %c0_i32_0 : i32, i32
  }
  func.func @transform_3(%arg0: i32) -> (i32, i32, i32) {
    %c0_i32 = arith.constant 0 : i32
    %c0_i32_0 = arith.constant 0 : i32
    %c0_i32_1 = arith.constant 0 : i32
    return %arg0, %c0_i32, %c0_i32_0 : i32, i32, i32
  }
}

module attributes {stable_mosaic.version = 11 : i64} {
  func.func @_conv_stats_kernel(%arg0: i32, %arg1: i32, %arg2: i32, %arg3: memref<1x1x16x4xf32, #tpu.memory_space<vmem>>, %arg4: memref<1x4x16x4xf32, #tpu.memory_space<vmem>>, %arg5: memref<1x1x16x4xf32, #tpu.memory_space<vmem>>, %arg6: memref<3x12x8xbf16, #tpu.memory_space<vmem>>, %arg7: memref<1x8xf32, #tpu.memory_space<vmem>>, %arg8: memref<1x4xf32, #tpu.memory_space<vmem>>, %arg9: memref<1x4xf32, #tpu.memory_space<vmem>>, %arg10: memref<1x4x16x8xbf16, #tpu.memory_space<vmem>>, %arg11: memref<1x1x2x8xf32, #tpu.memory_space<vmem>>, %arg12: memref<6x16x12xbf16, #tpu.memory_space<vmem>>) attributes {dimension_semantics = [#tpu.dimension_semantics<parallel>, #tpu.dimension_semantics<parallel>, #tpu.dimension_semantics<arbitrary>], iteration_bounds = array<i64: 2, 2, 2>, scalar_prefetch = 0 : i64, scratch_operands = 1 : i64, tpu.core_type = #tpu.core_type<tc>, window_params = [{transform_indices = @transform_0, window_bounds = array<i64: 1, 1, 16, 4>}, {transform_indices = @transform_1, window_bounds = array<i64: 1, 4, 16, 4>}, {transform_indices = @transform_2, window_bounds = array<i64: 1, 1, 16, 4>}, {pipeline_mode = #tpu.pipeline_mode<synchronous>, transform_indices = @transform_3, window_bounds = array<i64: 3, 12, 8>}, {pipeline_mode = #tpu.pipeline_mode<synchronous>, transform_indices = @transform_4, window_bounds = array<i64: 1, 8>}, {pipeline_mode = #tpu.pipeline_mode<synchronous>, transform_indices = @transform_5, window_bounds = array<i64: 1, 4>}, {pipeline_mode = #tpu.pipeline_mode<synchronous>, transform_indices = @transform_6, window_bounds = array<i64: 1, 4>}, {transform_indices = @transform_7, window_bounds = array<i64: 1, 4, 16, 8>}, {transform_indices = @transform_8, window_bounds = array<i64: 1, 1, 2, 8>}]} {
    %c2_i32 = arith.constant 2 : i32
    %0 = arith.muli %arg1, %c2_i32 : i32
    %1 = arith.addi %0, %arg2 : i32
    %2 = tpu.iota {dimensions = array<i32: 1>} : vector<1x16x1xi32>
    %c0 = arith.constant 0 : index
    %c0_0 = arith.constant 0 : index
    %c0_1 = arith.constant 0 : index
    %c0_2 = arith.constant 0 : index
    %3 = vector.load %arg3[%c0, %c0_0, %c0_1, %c0_2] : memref<1x1x16x4xf32, #tpu.memory_space<vmem>>, vector<1x1x16x4xf32>
    %4 = vector.shape_cast %3 : vector<1x1x16x4xf32> to vector<1x16x4xf32>
    %c0_i32 = arith.constant 0 : i32
    %5 = arith.cmpi sgt, %1, %c0_i32 : i32
    %cst = arith.constant 0.000000e+00 : f32
    %6 = vector.broadcast %cst : f32 to vector<1x16x4xf32>
    %7 = arith.select %5, %4, %6 : vector<1x16x4xf32>
    %c1_i32 = arith.constant 1 : i32
    %8 = vector.broadcast %c1_i32 : i32 to vector<1x16x1xi32>
    %9 = arith.cmpi sge, %2, %8 : vector<1x16x1xi32>
    %c1_i32_3 = arith.constant 1 : i32
    %10 = tpu.dynamic_rotate %7 by %c1_i32_3 dim 1 : vector<1x16x4xf32>, i32 -> vector<1x16x4xf32>
    %cst_4 = arith.constant 0.000000e+00 : f32
    %11 = vector.shape_cast %9 : vector<1x16x1xi1> to vector<1x16x1xi1>
    %12 = vector.broadcast %11 : vector<1x16x1xi1> to vector<1x16x4xi1>
    %13 = vector.broadcast %cst_4 : f32 to vector<1x16x4xf32>
    %14 = arith.select %12, %10, %13 : vector<1x16x4xi1>, vector<1x16x4xf32>
    %c15_i32 = arith.constant 15 : i32
    %15 = vector.broadcast %c15_i32 : i32 to vector<1x16x1xi32>
    %16 = arith.cmpi slt, %2, %15 : vector<1x16x1xi32>
    %c15_i32_5 = arith.constant 15 : i32
    %17 = tpu.dynamic_rotate %7 by %c15_i32_5 dim 1 : vector<1x16x4xf32>, i32 -> vector<1x16x4xf32>
    %cst_6 = arith.constant 0.000000e+00 : f32
    %18 = vector.shape_cast %16 : vector<1x16x1xi1> to vector<1x16x1xi1>
    %19 = vector.broadcast %18 : vector<1x16x1xi1> to vector<1x16x4xi1>
    %20 = vector.broadcast %cst_6 : f32 to vector<1x16x4xf32>
    %21 = arith.select %19, %17, %20 : vector<1x16x4xi1>, vector<1x16x4xf32>
    %22 = tpu.concatenate %14, %7, %21 in 2 : vector<1x16x4xf32>, vector<1x16x4xf32>, vector<1x16x4xf32> -> vector<1x16x12xf32>
    %23 = arith.truncf %22 : vector<1x16x12xf32> to vector<1x16x12xbf16>
    %c0_7 = arith.constant 0 : index
    %c0_8 = arith.constant 0 : index
    %c0_9 = arith.constant 0 : index
    %24 = vector.load %arg12[%c0_7, %c0_8, %c0_9] : memref<6x16x12xbf16, #tpu.memory_space<vmem>>, vector<1x16x12xbf16>
    tpu.vector_store %arg12[%c0_7, %c0_8, %c0_9], %23 {strides = array<i32>} : memref<6x16x12xbf16, #tpu.memory_space<vmem>>, vector<1x16x12xbf16>,
    %c0_10 = arith.constant 0 : index
    %c0_11 = arith.constant 0 : index
    %c0_12 = arith.constant 0 : index
    %c0_13 = arith.constant 0 : index
    %25 = vector.load %arg4[%c0_10, %c0_11, %c0_12, %c0_13] : memref<1x4x16x4xf32, #tpu.memory_space<vmem>>, vector<1x4x16x4xf32>
    %26 = vector.shape_cast %25 : vector<1x4x16x4xf32> to vector<4x16x4xf32>
    %c1_i32_14 = arith.constant 1 : i32
    %27 = vector.broadcast %c1_i32_14 : i32 to vector<1x16x1xi32>
    %28 = arith.cmpi sge, %2, %27 : vector<1x16x1xi32>
    %c1_i32_15 = arith.constant 1 : i32
    %29 = tpu.dynamic_rotate %26 by %c1_i32_15 dim 1 : vector<4x16x4xf32>, i32 -> vector<4x16x4xf32>
    %cst_16 = arith.constant 0.000000e+00 : f32
    %30 = vector.shape_cast %28 : vector<1x16x1xi1> to vector<1x16x1xi1>
    %31 = vector.broadcast %30 : vector<1x16x1xi1> to vector<4x16x4xi1>
    %32 = vector.broadcast %cst_16 : f32 to vector<4x16x4xf32>
    %33 = arith.select %31, %29, %32 : vector<4x16x4xi1>, vector<4x16x4xf32>
    %c15_i32_17 = arith.constant 15 : i32
    %34 = vector.broadcast %c15_i32_17 : i32 to vector<1x16x1xi32>
    %35 = arith.cmpi slt, %2, %34 : vector<1x16x1xi32>
    %c15_i32_18 = arith.constant 15 : i32
    %36 = tpu.dynamic_rotate %26 by %c15_i32_18 dim 1 : vector<4x16x4xf32>, i32 -> vector<4x16x4xf32>
    %cst_19 = arith.constant 0.000000e+00 : f32
    %37 = vector.shape_cast %35 : vector<1x16x1xi1> to vector<1x16x1xi1>
    %38 = vector.broadcast %37 : vector<1x16x1xi1> to vector<4x16x4xi1>
    %39 = vector.broadcast %cst_19 : f32 to vector<4x16x4xf32>
    %40 = arith.select %38, %36, %39 : vector<4x16x4xi1>, vector<4x16x4xf32>
    %41 = tpu.concatenate %33, %26, %40 in 2 : vector<4x16x4xf32>, vector<4x16x4xf32>, vector<4x16x4xf32> -> vector<4x16x12xf32>
    %42 = arith.truncf %41 : vector<4x16x12xf32> to vector<4x16x12xbf16>
    %c1 = arith.constant 1 : index
    %c0_20 = arith.constant 0 : index
    %c0_21 = arith.constant 0 : index
    %43 = vector.load %arg12[%c1, %c0_20, %c0_21] : memref<6x16x12xbf16, #tpu.memory_space<vmem>>, vector<4x16x12xbf16>
    tpu.vector_store %arg12[%c1, %c0_20, %c0_21], %42 {strides = array<i32>} : memref<6x16x12xbf16, #tpu.memory_space<vmem>>, vector<4x16x12xbf16>,
    %c0_22 = arith.constant 0 : index
    %c0_23 = arith.constant 0 : index
    %c0_24 = arith.constant 0 : index
    %c0_25 = arith.constant 0 : index
    %44 = vector.load %arg5[%c0_22, %c0_23, %c0_24, %c0_25] : memref<1x1x16x4xf32, #tpu.memory_space<vmem>>, vector<1x1x16x4xf32>
    %45 = vector.shape_cast %44 : vector<1x1x16x4xf32> to vector<1x16x4xf32>
    %c3_i32 = arith.constant 3 : i32
    %46 = arith.cmpi slt, %1, %c3_i32 : i32
    %cst_26 = arith.constant 0.000000e+00 : f32
    %47 = vector.broadcast %cst_26 : f32 to vector<1x16x4xf32>
    %48 = arith.select %46, %45, %47 : vector<1x16x4xf32>
    %c1_i32_27 = arith.constant 1 : i32
    %49 = vector.broadcast %c1_i32_27 : i32 to vector<1x16x1xi32>
    %50 = arith.cmpi sge, %2, %49 : vector<1x16x1xi32>
    %c1_i32_28 = arith.constant 1 : i32
    %51 = tpu.dynamic_rotate %48 by %c1_i32_28 dim 1 : vector<1x16x4xf32>, i32 -> vector<1x16x4xf32>
    %cst_29 = arith.constant 0.000000e+00 : f32
    %52 = vector.shape_cast %50 : vector<1x16x1xi1> to vector<1x16x1xi1>
    %53 = vector.broadcast %52 : vector<1x16x1xi1> to vector<1x16x4xi1>
    %54 = vector.broadcast %cst_29 : f32 to vector<1x16x4xf32>
    %55 = arith.select %53, %51, %54 : vector<1x16x4xi1>, vector<1x16x4xf32>
    %c15_i32_30 = arith.constant 15 : i32
    %56 = vector.broadcast %c15_i32_30 : i32 to vector<1x16x1xi32>
    %57 = arith.cmpi slt, %2, %56 : vector<1x16x1xi32>
    %c15_i32_31 = arith.constant 15 : i32
    %58 = tpu.dynamic_rotate %48 by %c15_i32_31 dim 1 : vector<1x16x4xf32>, i32 -> vector<1x16x4xf32>
    %cst_32 = arith.constant 0.000000e+00 : f32
    %59 = vector.shape_cast %57 : vector<1x16x1xi1> to vector<1x16x1xi1>
    %60 = vector.broadcast %59 : vector<1x16x1xi1> to vector<1x16x4xi1>
    %61 = vector.broadcast %cst_32 : f32 to vector<1x16x4xf32>
    %62 = arith.select %60, %58, %61 : vector<1x16x4xi1>, vector<1x16x4xf32>
    %63 = tpu.concatenate %55, %48, %62 in 2 : vector<1x16x4xf32>, vector<1x16x4xf32>, vector<1x16x4xf32> -> vector<1x16x12xf32>
    %64 = arith.truncf %63 : vector<1x16x12xf32> to vector<1x16x12xbf16>
    %c5 = arith.constant 5 : index
    %c0_33 = arith.constant 0 : index
    %c0_34 = arith.constant 0 : index
    %65 = vector.load %arg12[%c5, %c0_33, %c0_34] : memref<6x16x12xbf16, #tpu.memory_space<vmem>>, vector<1x16x12xbf16>
    tpu.vector_store %arg12[%c5, %c0_33, %c0_34], %64 {strides = array<i32>} : memref<6x16x12xbf16, #tpu.memory_space<vmem>>, vector<1x16x12xbf16>,
    %c0_35 = arith.constant 0 : index
    %c0_36 = arith.constant 0 : index
    %c0_37 = arith.constant 0 : index
    %66 = vector.load %arg12[%c0_35, %c0_36, %c0_37] : memref<6x16x12xbf16, #tpu.memory_space<vmem>>, vector<4x16x12xbf16>
    %67 = vector.shape_cast %66 : vector<4x16x12xbf16> to vector<64x12xbf16>
    %c0_38 = arith.constant 0 : index
    %c0_39 = arith.constant 0 : index
    %c0_40 = arith.constant 0 : index
    %68 = vector.load %arg6[%c0_38, %c0_39, %c0_40] : memref<3x12x8xbf16, #tpu.memory_space<vmem>>, vector<1x12x8xbf16>
    %69 = vector.shape_cast %68 : vector<1x12x8xbf16> to vector<12x8xbf16>
    %cst_41 = arith.constant dense<0.000000e+00> : vector<64x8xf32>
    %70 = tpu.matmul %67, %69, %cst_41 {dimension_numbers = #tpu.dot_dimension_numbers<[1], [0], [0], [1], [0, 0, 1, 1], [], []>} : vector<64x12xbf16>, vector<12x8xbf16>, vector<64x8xf32> -> vector<64x8xf32>
    %c1_42 = arith.constant 1 : index
    %c0_43 = arith.constant 0 : index
    %c0_44 = arith.constant 0 : index
    %71 = vector.load %arg12[%c1_42, %c0_43, %c0_44] : memref<6x16x12xbf16, #tpu.memory_space<vmem>>, vector<4x16x12xbf16>
    %72 = vector.shape_cast %71 : vector<4x16x12xbf16> to vector<64x12xbf16>
    %c1_45 = arith.constant 1 : index
    %c0_46 = arith.constant 0 : index
    %c0_47 = arith.constant 0 : index
    %73 = vector.load %arg6[%c1_45, %c0_46, %c0_47] : memref<3x12x8xbf16, #tpu.memory_space<vmem>>, vector<1x12x8xbf16>
    %74 = vector.shape_cast %73 : vector<1x12x8xbf16> to vector<12x8xbf16>
    %cst_48 = arith.constant dense<0.000000e+00> : vector<64x8xf32>
    %75 = tpu.matmul %72, %74, %cst_48 {dimension_numbers = #tpu.dot_dimension_numbers<[1], [0], [0], [1], [0, 0, 1, 1], [], []>} : vector<64x12xbf16>, vector<12x8xbf16>, vector<64x8xf32> -> vector<64x8xf32>
    %76 = arith.addf %70, %75 : vector<64x8xf32>
    %c2 = arith.constant 2 : index
    %c0_49 = arith.constant 0 : index
    %c0_50 = arith.constant 0 : index
    %77 = vector.load %arg12[%c2, %c0_49, %c0_50] : memref<6x16x12xbf16, #tpu.memory_space<vmem>>, vector<4x16x12xbf16>
    %78 = vector.shape_cast %77 : vector<4x16x12xbf16> to vector<64x12xbf16>
    %c2_51 = arith.constant 2 : index
    %c0_52 = arith.constant 0 : index
    %c0_53 = arith.constant 0 : index
    %79 = vector.load %arg6[%c2_51, %c0_52, %c0_53] : memref<3x12x8xbf16, #tpu.memory_space<vmem>>, vector<1x12x8xbf16>
    %80 = vector.shape_cast %79 : vector<1x12x8xbf16> to vector<12x8xbf16>
    %cst_54 = arith.constant dense<0.000000e+00> : vector<64x8xf32>
    %81 = tpu.matmul %78, %80, %cst_54 {dimension_numbers = #tpu.dot_dimension_numbers<[1], [0], [0], [1], [0, 0, 1, 1], [], []>} : vector<64x12xbf16>, vector<12x8xbf16>, vector<64x8xf32> -> vector<64x8xf32>
    %82 = arith.addf %76, %81 : vector<64x8xf32>
    %c0_55 = arith.constant 0 : index
    %c0_56 = arith.constant 0 : index
    %83 = vector.load %arg7[%c0_55, %c0_56] : memref<1x8xf32, #tpu.memory_space<vmem>>, vector<1x8xf32>
    %84 = vector.broadcast %83 : vector<1x8xf32> to vector<64x8xf32>
    %85 = arith.addf %82, %84 : vector<64x8xf32>
    %86 = vector.shape_cast %85 : vector<64x8xf32> to vector<1x4x16x8xf32>
    %87 = arith.truncf %86 : vector<1x4x16x8xf32> to vector<1x4x16x8xbf16>
    %c0_57 = arith.constant 0 : index
    %c0_58 = arith.constant 0 : index
    %c0_59 = arith.constant 0 : index
    %c0_60 = arith.constant 0 : index
    %88 = vector.load %arg10[%c0_57, %c0_58, %c0_59, %c0_60] : memref<1x4x16x8xbf16, #tpu.memory_space<vmem>>, vector<1x4x16x8xbf16>
    tpu.vector_store %arg10[%c0_57, %c0_58, %c0_59, %c0_60], %87 {strides = array<i32>} : memref<1x4x16x8xbf16, #tpu.memory_space<vmem>>, vector<1x4x16x8xbf16>,
    %cst_61 = arith.constant dense<0.000000e+00> : vector<8xf32>
    %89 = vector.multi_reduction <add>, %85, %cst_61 [0] : vector<64x8xf32> to vector<8xf32>
    %90 = vector.shape_cast %89 : vector<8xf32> to vector<1x8xf32>
    %91 = arith.mulf %85, %85 : vector<64x8xf32>
    %cst_62 = arith.constant dense<0.000000e+00> : vector<8xf32>
    %92 = vector.multi_reduction <add>, %91, %cst_62 [0] : vector<64x8xf32> to vector<8xf32>
    %93 = vector.shape_cast %92 : vector<8xf32> to vector<1x8xf32>
    %94 = tpu.concatenate %90, %93 in 0 : vector<1x8xf32>, vector<1x8xf32> -> vector<2x8xf32>
    %95 = vector.shape_cast %94 : vector<2x8xf32> to vector<1x1x2x8xf32>
    %c0_i32_63 = arith.constant 0 : i32
    %96 = arith.cmpi eq, %arg2, %c0_i32_63 : i32
    %97 = arith.extui %96 : i1 to i32
    %c0_i32_64 = arith.constant 0 : i32
    %98 = arith.cmpi ne, %97, %c0_i32_64 : i32
    scf.if %98 {
      %cst_73 = arith.constant 0.000000e+00 : f32
      %102 = vector.broadcast %cst_73 : f32 to vector<1x1x2x8xf32>
      %c0_74 = arith.constant 0 : index
      %c0_75 = arith.constant 0 : index
      %c0_76 = arith.constant 0 : index
      %c0_77 = arith.constant 0 : index
      %103 = vector.load %arg11[%c0_74, %c0_75, %c0_76, %c0_77] : memref<1x1x2x8xf32, #tpu.memory_space<vmem>>, vector<1x1x2x8xf32>
      tpu.vector_store %arg11[%c0_74, %c0_75, %c0_76, %c0_77], %102 {strides = array<i32>} : memref<1x1x2x8xf32, #tpu.memory_space<vmem>>, vector<1x1x2x8xf32>,
    } else {
    }
    %c0_65 = arith.constant 0 : index
    %c0_66 = arith.constant 0 : index
    %c0_67 = arith.constant 0 : index
    %c0_68 = arith.constant 0 : index
    %99 = vector.load %arg11[%c0_65, %c0_66, %c0_67, %c0_68] : memref<1x1x2x8xf32, #tpu.memory_space<vmem>>, vector<1x1x2x8xf32>
    %100 = arith.addf %99, %95 : vector<1x1x2x8xf32>
    %c0_69 = arith.constant 0 : index
    %c0_70 = arith.constant 0 : index
    %c0_71 = arith.constant 0 : index
    %c0_72 = arith.constant 0 : index
    %101 = vector.load %arg11[%c0_69, %c0_70, %c0_71, %c0_72] : memref<1x1x2x8xf32, #tpu.memory_space<vmem>>, vector<1x1x2x8xf32>
    tpu.vector_store %arg11[%c0_69, %c0_70, %c0_71, %c0_72], %100 {strides = array<i32>} : memref<1x1x2x8xf32, #tpu.memory_space<vmem>>, vector<1x1x2x8xf32>,
    return
  }
  func.func @transform_0(%arg0: i32, %arg1: i32, %arg2: i32) -> (i32, i32, i32, i32) {
    %c2_i32 = arith.constant 2 : i32
    %0 = arith.muli %arg1, %c2_i32 : i32
    %1 = arith.addi %0, %arg2 : i32
    %c4_i32 = arith.constant 4 : i32
    %2 = arith.muli %1, %c4_i32 : i32
    %c1_i32 = arith.constant 1 : i32
    %3 = arith.subi %2, %c1_i32 : i32
    %c0_i32 = arith.constant 0 : i32
    %4 = arith.maxsi %3, %c0_i32 : i32
    %c0_i32_0 = arith.constant 0 : i32
    %c0_i32_1 = arith.constant 0 : i32
    %c0_i32_2 = arith.constant 0 : i32
    return %arg0, %4, %c0_i32_0, %c0_i32_1 : i32, i32, i32, i32
  }
  func.func @transform_1(%arg0: i32, %arg1: i32, %arg2: i32) -> (i32, i32, i32, i32) {
    %c2_i32 = arith.constant 2 : i32
    %0 = arith.muli %arg1, %c2_i32 : i32
    %1 = arith.addi %0, %arg2 : i32
    %c0_i32 = arith.constant 0 : i32
    %c0_i32_0 = arith.constant 0 : i32
    %c0_i32_1 = arith.constant 0 : i32
    return %arg0, %1, %c0_i32, %c0_i32_0 : i32, i32, i32, i32
  }
  func.func @transform_2(%arg0: i32, %arg1: i32, %arg2: i32) -> (i32, i32, i32, i32) {
    %c2_i32 = arith.constant 2 : i32
    %0 = arith.muli %arg1, %c2_i32 : i32
    %1 = arith.addi %0, %arg2 : i32
    %c4_i32 = arith.constant 4 : i32
    %2 = arith.muli %1, %c4_i32 : i32
    %c4_i32_0 = arith.constant 4 : i32
    %3 = arith.addi %2, %c4_i32_0 : i32
    %c15_i32 = arith.constant 15 : i32
    %4 = arith.minsi %3, %c15_i32 : i32
    %c0_i32 = arith.constant 0 : i32
    %c0_i32_1 = arith.constant 0 : i32
    %c0_i32_2 = arith.constant 0 : i32
    return %arg0, %4, %c0_i32, %c0_i32_1 : i32, i32, i32, i32
  }
  func.func @transform_3(%arg0: i32, %arg1: i32, %arg2: i32) -> (i32, i32, i32) {
    %c0_i32 = arith.constant 0 : i32
    %c0_i32_0 = arith.constant 0 : i32
    %c0_i32_1 = arith.constant 0 : i32
    %c0_i32_2 = arith.constant 0 : i32
    return %c0_i32, %c0_i32_0, %c0_i32_1 : i32, i32, i32
  }
  func.func @transform_4(%arg0: i32, %arg1: i32, %arg2: i32) -> (i32, i32) {
    %c0_i32 = arith.constant 0 : i32
    %c0_i32_0 = arith.constant 0 : i32
    %c0_i32_1 = arith.constant 0 : i32
    return %c0_i32, %c0_i32_0 : i32, i32
  }
  func.func @transform_5(%arg0: i32, %arg1: i32, %arg2: i32) -> (i32, i32) {
    %c0_i32 = arith.constant 0 : i32
    %c0_i32_0 = arith.constant 0 : i32
    %c0_i32_1 = arith.constant 0 : i32
    return %c0_i32, %c0_i32_0 : i32, i32
  }
  func.func @transform_6(%arg0: i32, %arg1: i32, %arg2: i32) -> (i32, i32) {
    %c0_i32 = arith.constant 0 : i32
    %c0_i32_0 = arith.constant 0 : i32
    %c0_i32_1 = arith.constant 0 : i32
    return %c0_i32, %c0_i32_0 : i32, i32
  }
  func.func @transform_7(%arg0: i32, %arg1: i32, %arg2: i32) -> (i32, i32, i32, i32) {
    %c2_i32 = arith.constant 2 : i32
    %0 = arith.muli %arg1, %c2_i32 : i32
    %1 = arith.addi %0, %arg2 : i32
    %c0_i32 = arith.constant 0 : i32
    %c0_i32_0 = arith.constant 0 : i32
    %c0_i32_1 = arith.constant 0 : i32
    return %arg0, %1, %c0_i32, %c0_i32_0 : i32, i32, i32, i32
  }
  func.func @transform_8(%arg0: i32, %arg1: i32, %arg2: i32) -> (i32, i32, i32, i32) {
    %c0_i32 = arith.constant 0 : i32
    %c0_i32_0 = arith.constant 0 : i32
    %c0_i32_1 = arith.constant 0 : i32
    return %arg0, %arg1, %c0_i32, %c0_i32_0 : i32, i32, i32, i32
  }
}

module attributes {stable_mosaic.version = 11 : i64} {
  func.func @_conv_stats_kernel(%arg0: i32, %arg1: i32, %arg2: i32, %arg3: memref<1x1x16x8xbf16, #tpu.memory_space<vmem>>, %arg4: memref<1x4x16x8xbf16, #tpu.memory_space<vmem>>, %arg5: memref<1x1x16x8xbf16, #tpu.memory_space<vmem>>, %arg6: memref<3x24x8xbf16, #tpu.memory_space<vmem>>, %arg7: memref<1x8xf32, #tpu.memory_space<vmem>>, %arg8: memref<1x8xf32, #tpu.memory_space<vmem>>, %arg9: memref<1x8xf32, #tpu.memory_space<vmem>>, %arg10: memref<1x4x16x8xbf16, #tpu.memory_space<vmem>>, %arg11: memref<1x1x2x8xf32, #tpu.memory_space<vmem>>, %arg12: memref<6x16x24xbf16, #tpu.memory_space<vmem>>) attributes {dimension_semantics = [#tpu.dimension_semantics<parallel>, #tpu.dimension_semantics<parallel>, #tpu.dimension_semantics<arbitrary>], iteration_bounds = array<i64: 2, 2, 2>, scalar_prefetch = 0 : i64, scratch_operands = 1 : i64, tpu.core_type = #tpu.core_type<tc>, window_params = [{transform_indices = @transform_0, window_bounds = array<i64: 1, 1, 16, 8>}, {transform_indices = @transform_1, window_bounds = array<i64: 1, 4, 16, 8>}, {transform_indices = @transform_2, window_bounds = array<i64: 1, 1, 16, 8>}, {pipeline_mode = #tpu.pipeline_mode<synchronous>, transform_indices = @transform_3, window_bounds = array<i64: 3, 24, 8>}, {pipeline_mode = #tpu.pipeline_mode<synchronous>, transform_indices = @transform_4, window_bounds = array<i64: 1, 8>}, {pipeline_mode = #tpu.pipeline_mode<synchronous>, transform_indices = @transform_5, window_bounds = array<i64: 1, 8>}, {pipeline_mode = #tpu.pipeline_mode<synchronous>, transform_indices = @transform_6, window_bounds = array<i64: 1, 8>}, {transform_indices = @transform_7, window_bounds = array<i64: 1, 4, 16, 8>}, {transform_indices = @transform_8, window_bounds = array<i64: 1, 1, 2, 8>}]} {
    %c2_i32 = arith.constant 2 : i32
    %0 = arith.muli %arg1, %c2_i32 : i32
    %1 = arith.addi %0, %arg2 : i32
    %2 = tpu.iota {dimensions = array<i32: 1>} : vector<1x16x1xi32>
    %c0 = arith.constant 0 : index
    %c0_0 = arith.constant 0 : index
    %c0_1 = arith.constant 0 : index
    %c0_2 = arith.constant 0 : index
    %3 = vector.load %arg3[%c0, %c0_0, %c0_1, %c0_2] : memref<1x1x16x8xbf16, #tpu.memory_space<vmem>>, vector<1x1x16x8xbf16>
    %4 = vector.shape_cast %3 : vector<1x1x16x8xbf16> to vector<1x16x8xbf16>
    %c0_i32 = arith.constant 0 : i32
    %5 = arith.cmpi sgt, %1, %c0_i32 : i32
    %6 = arith.extf %4 : vector<1x16x8xbf16> to vector<1x16x8xf32>
    %c0_3 = arith.constant 0 : index
    %c0_4 = arith.constant 0 : index
    %7 = vector.load %arg8[%c0_3, %c0_4] : memref<1x8xf32, #tpu.memory_space<vmem>>, vector<1x8xf32>
    %8 = vector.shape_cast %7 : vector<1x8xf32> to vector<1x1x8xf32>
    %9 = vector.broadcast %8 : vector<1x1x8xf32> to vector<1x16x8xf32>
    %10 = arith.mulf %6, %9 : vector<1x16x8xf32>
    %c0_5 = arith.constant 0 : index
    %c0_6 = arith.constant 0 : index
    %11 = vector.load %arg9[%c0_5, %c0_6] : memref<1x8xf32, #tpu.memory_space<vmem>>, vector<1x8xf32>
    %12 = vector.shape_cast %11 : vector<1x8xf32> to vector<1x1x8xf32>
    %13 = vector.broadcast %12 : vector<1x1x8xf32> to vector<1x16x8xf32>
    %14 = arith.addf %10, %13 : vector<1x16x8xf32>
    %cst = arith.constant 0.000000e+00 : f32
    %15 = vector.broadcast %cst : f32 to vector<1x16x8xf32>
    %16 = arith.maximumf %14, %15 : vector<1x16x8xf32>
    %cst_7 = arith.constant 0.000000e+00 : f32
    %17 = vector.broadcast %cst_7 : f32 to vector<1x16x8xf32>
    %18 = arith.select %5, %16, %17 : vector<1x16x8xf32>
    %c1_i32 = arith.constant 1 : i32
    %19 = vector.broadcast %c1_i32 : i32 to vector<1x16x1xi32>
    %20 = arith.cmpi sge, %2, %19 : vector<1x16x1xi32>
    %c1_i32_8 = arith.constant 1 : i32
    %21 = tpu.dynamic_rotate %18 by %c1_i32_8 dim 1 : vector<1x16x8xf32>, i32 -> vector<1x16x8xf32>
    %cst_9 = arith.constant 0.000000e+00 : f32
    %22 = vector.shape_cast %20 : vector<1x16x1xi1> to vector<1x16x1xi1>
    %23 = vector.broadcast %22 : vector<1x16x1xi1> to vector<1x16x8xi1>
    %24 = vector.broadcast %cst_9 : f32 to vector<1x16x8xf32>
    %25 = arith.select %23, %21, %24 : vector<1x16x8xi1>, vector<1x16x8xf32>
    %c15_i32 = arith.constant 15 : i32
    %26 = vector.broadcast %c15_i32 : i32 to vector<1x16x1xi32>
    %27 = arith.cmpi slt, %2, %26 : vector<1x16x1xi32>
    %c15_i32_10 = arith.constant 15 : i32
    %28 = tpu.dynamic_rotate %18 by %c15_i32_10 dim 1 : vector<1x16x8xf32>, i32 -> vector<1x16x8xf32>
    %cst_11 = arith.constant 0.000000e+00 : f32
    %29 = vector.shape_cast %27 : vector<1x16x1xi1> to vector<1x16x1xi1>
    %30 = vector.broadcast %29 : vector<1x16x1xi1> to vector<1x16x8xi1>
    %31 = vector.broadcast %cst_11 : f32 to vector<1x16x8xf32>
    %32 = arith.select %30, %28, %31 : vector<1x16x8xi1>, vector<1x16x8xf32>
    %33 = tpu.concatenate %25, %18, %32 in 2 : vector<1x16x8xf32>, vector<1x16x8xf32>, vector<1x16x8xf32> -> vector<1x16x24xf32>
    %34 = arith.truncf %33 : vector<1x16x24xf32> to vector<1x16x24xbf16>
    %c0_12 = arith.constant 0 : index
    %c0_13 = arith.constant 0 : index
    %c0_14 = arith.constant 0 : index
    %35 = vector.load %arg12[%c0_12, %c0_13, %c0_14] : memref<6x16x24xbf16, #tpu.memory_space<vmem>>, vector<1x16x24xbf16>
    tpu.vector_store %arg12[%c0_12, %c0_13, %c0_14], %34 {strides = array<i32>} : memref<6x16x24xbf16, #tpu.memory_space<vmem>>, vector<1x16x24xbf16>,
    %c0_15 = arith.constant 0 : index
    %c0_16 = arith.constant 0 : index
    %c0_17 = arith.constant 0 : index
    %c0_18 = arith.constant 0 : index
    %36 = vector.load %arg4[%c0_15, %c0_16, %c0_17, %c0_18] : memref<1x4x16x8xbf16, #tpu.memory_space<vmem>>, vector<1x4x16x8xbf16>
    %37 = vector.shape_cast %36 : vector<1x4x16x8xbf16> to vector<4x16x8xbf16>
    %38 = arith.extf %37 : vector<4x16x8xbf16> to vector<4x16x8xf32>
    %c0_19 = arith.constant 0 : index
    %c0_20 = arith.constant 0 : index
    %39 = vector.load %arg8[%c0_19, %c0_20] : memref<1x8xf32, #tpu.memory_space<vmem>>, vector<1x8xf32>
    %40 = vector.shape_cast %39 : vector<1x8xf32> to vector<1x1x8xf32>
    %41 = vector.broadcast %40 : vector<1x1x8xf32> to vector<4x16x8xf32>
    %42 = arith.mulf %38, %41 : vector<4x16x8xf32>
    %c0_21 = arith.constant 0 : index
    %c0_22 = arith.constant 0 : index
    %43 = vector.load %arg9[%c0_21, %c0_22] : memref<1x8xf32, #tpu.memory_space<vmem>>, vector<1x8xf32>
    %44 = vector.shape_cast %43 : vector<1x8xf32> to vector<1x1x8xf32>
    %45 = vector.broadcast %44 : vector<1x1x8xf32> to vector<4x16x8xf32>
    %46 = arith.addf %42, %45 : vector<4x16x8xf32>
    %cst_23 = arith.constant 0.000000e+00 : f32
    %47 = vector.broadcast %cst_23 : f32 to vector<4x16x8xf32>
    %48 = arith.maximumf %46, %47 : vector<4x16x8xf32>
    %c1_i32_24 = arith.constant 1 : i32
    %49 = vector.broadcast %c1_i32_24 : i32 to vector<1x16x1xi32>
    %50 = arith.cmpi sge, %2, %49 : vector<1x16x1xi32>
    %c1_i32_25 = arith.constant 1 : i32
    %51 = tpu.dynamic_rotate %48 by %c1_i32_25 dim 1 : vector<4x16x8xf32>, i32 -> vector<4x16x8xf32>
    %cst_26 = arith.constant 0.000000e+00 : f32
    %52 = vector.shape_cast %50 : vector<1x16x1xi1> to vector<1x16x1xi1>
    %53 = vector.broadcast %52 : vector<1x16x1xi1> to vector<4x16x8xi1>
    %54 = vector.broadcast %cst_26 : f32 to vector<4x16x8xf32>
    %55 = arith.select %53, %51, %54 : vector<4x16x8xi1>, vector<4x16x8xf32>
    %c15_i32_27 = arith.constant 15 : i32
    %56 = vector.broadcast %c15_i32_27 : i32 to vector<1x16x1xi32>
    %57 = arith.cmpi slt, %2, %56 : vector<1x16x1xi32>
    %c15_i32_28 = arith.constant 15 : i32
    %58 = tpu.dynamic_rotate %48 by %c15_i32_28 dim 1 : vector<4x16x8xf32>, i32 -> vector<4x16x8xf32>
    %cst_29 = arith.constant 0.000000e+00 : f32
    %59 = vector.shape_cast %57 : vector<1x16x1xi1> to vector<1x16x1xi1>
    %60 = vector.broadcast %59 : vector<1x16x1xi1> to vector<4x16x8xi1>
    %61 = vector.broadcast %cst_29 : f32 to vector<4x16x8xf32>
    %62 = arith.select %60, %58, %61 : vector<4x16x8xi1>, vector<4x16x8xf32>
    %63 = tpu.concatenate %55, %48, %62 in 2 : vector<4x16x8xf32>, vector<4x16x8xf32>, vector<4x16x8xf32> -> vector<4x16x24xf32>
    %64 = arith.truncf %63 : vector<4x16x24xf32> to vector<4x16x24xbf16>
    %c1 = arith.constant 1 : index
    %c0_30 = arith.constant 0 : index
    %c0_31 = arith.constant 0 : index
    %65 = vector.load %arg12[%c1, %c0_30, %c0_31] : memref<6x16x24xbf16, #tpu.memory_space<vmem>>, vector<4x16x24xbf16>
    tpu.vector_store %arg12[%c1, %c0_30, %c0_31], %64 {strides = array<i32>} : memref<6x16x24xbf16, #tpu.memory_space<vmem>>, vector<4x16x24xbf16>,
    %c0_32 = arith.constant 0 : index
    %c0_33 = arith.constant 0 : index
    %c0_34 = arith.constant 0 : index
    %c0_35 = arith.constant 0 : index
    %66 = vector.load %arg5[%c0_32, %c0_33, %c0_34, %c0_35] : memref<1x1x16x8xbf16, #tpu.memory_space<vmem>>, vector<1x1x16x8xbf16>
    %67 = vector.shape_cast %66 : vector<1x1x16x8xbf16> to vector<1x16x8xbf16>
    %c3_i32 = arith.constant 3 : i32
    %68 = arith.cmpi slt, %1, %c3_i32 : i32
    %69 = arith.extf %67 : vector<1x16x8xbf16> to vector<1x16x8xf32>
    %c0_36 = arith.constant 0 : index
    %c0_37 = arith.constant 0 : index
    %70 = vector.load %arg8[%c0_36, %c0_37] : memref<1x8xf32, #tpu.memory_space<vmem>>, vector<1x8xf32>
    %71 = vector.shape_cast %70 : vector<1x8xf32> to vector<1x1x8xf32>
    %72 = vector.broadcast %71 : vector<1x1x8xf32> to vector<1x16x8xf32>
    %73 = arith.mulf %69, %72 : vector<1x16x8xf32>
    %c0_38 = arith.constant 0 : index
    %c0_39 = arith.constant 0 : index
    %74 = vector.load %arg9[%c0_38, %c0_39] : memref<1x8xf32, #tpu.memory_space<vmem>>, vector<1x8xf32>
    %75 = vector.shape_cast %74 : vector<1x8xf32> to vector<1x1x8xf32>
    %76 = vector.broadcast %75 : vector<1x1x8xf32> to vector<1x16x8xf32>
    %77 = arith.addf %73, %76 : vector<1x16x8xf32>
    %cst_40 = arith.constant 0.000000e+00 : f32
    %78 = vector.broadcast %cst_40 : f32 to vector<1x16x8xf32>
    %79 = arith.maximumf %77, %78 : vector<1x16x8xf32>
    %cst_41 = arith.constant 0.000000e+00 : f32
    %80 = vector.broadcast %cst_41 : f32 to vector<1x16x8xf32>
    %81 = arith.select %68, %79, %80 : vector<1x16x8xf32>
    %c1_i32_42 = arith.constant 1 : i32
    %82 = vector.broadcast %c1_i32_42 : i32 to vector<1x16x1xi32>
    %83 = arith.cmpi sge, %2, %82 : vector<1x16x1xi32>
    %c1_i32_43 = arith.constant 1 : i32
    %84 = tpu.dynamic_rotate %81 by %c1_i32_43 dim 1 : vector<1x16x8xf32>, i32 -> vector<1x16x8xf32>
    %cst_44 = arith.constant 0.000000e+00 : f32
    %85 = vector.shape_cast %83 : vector<1x16x1xi1> to vector<1x16x1xi1>
    %86 = vector.broadcast %85 : vector<1x16x1xi1> to vector<1x16x8xi1>
    %87 = vector.broadcast %cst_44 : f32 to vector<1x16x8xf32>
    %88 = arith.select %86, %84, %87 : vector<1x16x8xi1>, vector<1x16x8xf32>
    %c15_i32_45 = arith.constant 15 : i32
    %89 = vector.broadcast %c15_i32_45 : i32 to vector<1x16x1xi32>
    %90 = arith.cmpi slt, %2, %89 : vector<1x16x1xi32>
    %c15_i32_46 = arith.constant 15 : i32
    %91 = tpu.dynamic_rotate %81 by %c15_i32_46 dim 1 : vector<1x16x8xf32>, i32 -> vector<1x16x8xf32>
    %cst_47 = arith.constant 0.000000e+00 : f32
    %92 = vector.shape_cast %90 : vector<1x16x1xi1> to vector<1x16x1xi1>
    %93 = vector.broadcast %92 : vector<1x16x1xi1> to vector<1x16x8xi1>
    %94 = vector.broadcast %cst_47 : f32 to vector<1x16x8xf32>
    %95 = arith.select %93, %91, %94 : vector<1x16x8xi1>, vector<1x16x8xf32>
    %96 = tpu.concatenate %88, %81, %95 in 2 : vector<1x16x8xf32>, vector<1x16x8xf32>, vector<1x16x8xf32> -> vector<1x16x24xf32>
    %97 = arith.truncf %96 : vector<1x16x24xf32> to vector<1x16x24xbf16>
    %c5 = arith.constant 5 : index
    %c0_48 = arith.constant 0 : index
    %c0_49 = arith.constant 0 : index
    %98 = vector.load %arg12[%c5, %c0_48, %c0_49] : memref<6x16x24xbf16, #tpu.memory_space<vmem>>, vector<1x16x24xbf16>
    tpu.vector_store %arg12[%c5, %c0_48, %c0_49], %97 {strides = array<i32>} : memref<6x16x24xbf16, #tpu.memory_space<vmem>>, vector<1x16x24xbf16>,
    %c0_50 = arith.constant 0 : index
    %c0_51 = arith.constant 0 : index
    %c0_52 = arith.constant 0 : index
    %99 = vector.load %arg12[%c0_50, %c0_51, %c0_52] : memref<6x16x24xbf16, #tpu.memory_space<vmem>>, vector<4x16x24xbf16>
    %100 = vector.shape_cast %99 : vector<4x16x24xbf16> to vector<64x24xbf16>
    %c0_53 = arith.constant 0 : index
    %c0_54 = arith.constant 0 : index
    %c0_55 = arith.constant 0 : index
    %101 = vector.load %arg6[%c0_53, %c0_54, %c0_55] : memref<3x24x8xbf16, #tpu.memory_space<vmem>>, vector<1x24x8xbf16>
    %102 = vector.shape_cast %101 : vector<1x24x8xbf16> to vector<24x8xbf16>
    %cst_56 = arith.constant dense<0.000000e+00> : vector<64x8xf32>
    %103 = tpu.matmul %100, %102, %cst_56 {dimension_numbers = #tpu.dot_dimension_numbers<[1], [0], [0], [1], [0, 0, 1, 1], [], []>} : vector<64x24xbf16>, vector<24x8xbf16>, vector<64x8xf32> -> vector<64x8xf32>
    %c1_57 = arith.constant 1 : index
    %c0_58 = arith.constant 0 : index
    %c0_59 = arith.constant 0 : index
    %104 = vector.load %arg12[%c1_57, %c0_58, %c0_59] : memref<6x16x24xbf16, #tpu.memory_space<vmem>>, vector<4x16x24xbf16>
    %105 = vector.shape_cast %104 : vector<4x16x24xbf16> to vector<64x24xbf16>
    %c1_60 = arith.constant 1 : index
    %c0_61 = arith.constant 0 : index
    %c0_62 = arith.constant 0 : index
    %106 = vector.load %arg6[%c1_60, %c0_61, %c0_62] : memref<3x24x8xbf16, #tpu.memory_space<vmem>>, vector<1x24x8xbf16>
    %107 = vector.shape_cast %106 : vector<1x24x8xbf16> to vector<24x8xbf16>
    %cst_63 = arith.constant dense<0.000000e+00> : vector<64x8xf32>
    %108 = tpu.matmul %105, %107, %cst_63 {dimension_numbers = #tpu.dot_dimension_numbers<[1], [0], [0], [1], [0, 0, 1, 1], [], []>} : vector<64x24xbf16>, vector<24x8xbf16>, vector<64x8xf32> -> vector<64x8xf32>
    %109 = arith.addf %103, %108 : vector<64x8xf32>
    %c2 = arith.constant 2 : index
    %c0_64 = arith.constant 0 : index
    %c0_65 = arith.constant 0 : index
    %110 = vector.load %arg12[%c2, %c0_64, %c0_65] : memref<6x16x24xbf16, #tpu.memory_space<vmem>>, vector<4x16x24xbf16>
    %111 = vector.shape_cast %110 : vector<4x16x24xbf16> to vector<64x24xbf16>
    %c2_66 = arith.constant 2 : index
    %c0_67 = arith.constant 0 : index
    %c0_68 = arith.constant 0 : index
    %112 = vector.load %arg6[%c2_66, %c0_67, %c0_68] : memref<3x24x8xbf16, #tpu.memory_space<vmem>>, vector<1x24x8xbf16>
    %113 = vector.shape_cast %112 : vector<1x24x8xbf16> to vector<24x8xbf16>
    %cst_69 = arith.constant dense<0.000000e+00> : vector<64x8xf32>
    %114 = tpu.matmul %111, %113, %cst_69 {dimension_numbers = #tpu.dot_dimension_numbers<[1], [0], [0], [1], [0, 0, 1, 1], [], []>} : vector<64x24xbf16>, vector<24x8xbf16>, vector<64x8xf32> -> vector<64x8xf32>
    %115 = arith.addf %109, %114 : vector<64x8xf32>
    %c0_70 = arith.constant 0 : index
    %c0_71 = arith.constant 0 : index
    %116 = vector.load %arg7[%c0_70, %c0_71] : memref<1x8xf32, #tpu.memory_space<vmem>>, vector<1x8xf32>
    %117 = vector.broadcast %116 : vector<1x8xf32> to vector<64x8xf32>
    %118 = arith.addf %115, %117 : vector<64x8xf32>
    %119 = vector.shape_cast %118 : vector<64x8xf32> to vector<1x4x16x8xf32>
    %120 = arith.truncf %119 : vector<1x4x16x8xf32> to vector<1x4x16x8xbf16>
    %c0_72 = arith.constant 0 : index
    %c0_73 = arith.constant 0 : index
    %c0_74 = arith.constant 0 : index
    %c0_75 = arith.constant 0 : index
    %121 = vector.load %arg10[%c0_72, %c0_73, %c0_74, %c0_75] : memref<1x4x16x8xbf16, #tpu.memory_space<vmem>>, vector<1x4x16x8xbf16>
    tpu.vector_store %arg10[%c0_72, %c0_73, %c0_74, %c0_75], %120 {strides = array<i32>} : memref<1x4x16x8xbf16, #tpu.memory_space<vmem>>, vector<1x4x16x8xbf16>,
    %cst_76 = arith.constant dense<0.000000e+00> : vector<8xf32>
    %122 = vector.multi_reduction <add>, %118, %cst_76 [0] : vector<64x8xf32> to vector<8xf32>
    %123 = vector.shape_cast %122 : vector<8xf32> to vector<1x8xf32>
    %124 = arith.mulf %118, %118 : vector<64x8xf32>
    %cst_77 = arith.constant dense<0.000000e+00> : vector<8xf32>
    %125 = vector.multi_reduction <add>, %124, %cst_77 [0] : vector<64x8xf32> to vector<8xf32>
    %126 = vector.shape_cast %125 : vector<8xf32> to vector<1x8xf32>
    %127 = tpu.concatenate %123, %126 in 0 : vector<1x8xf32>, vector<1x8xf32> -> vector<2x8xf32>
    %128 = vector.shape_cast %127 : vector<2x8xf32> to vector<1x1x2x8xf32>
    %c0_i32_78 = arith.constant 0 : i32
    %129 = arith.cmpi eq, %arg2, %c0_i32_78 : i32
    %130 = arith.extui %129 : i1 to i32
    %c0_i32_79 = arith.constant 0 : i32
    %131 = arith.cmpi ne, %130, %c0_i32_79 : i32
    scf.if %131 {
      %cst_88 = arith.constant 0.000000e+00 : f32
      %135 = vector.broadcast %cst_88 : f32 to vector<1x1x2x8xf32>
      %c0_89 = arith.constant 0 : index
      %c0_90 = arith.constant 0 : index
      %c0_91 = arith.constant 0 : index
      %c0_92 = arith.constant 0 : index
      %136 = vector.load %arg11[%c0_89, %c0_90, %c0_91, %c0_92] : memref<1x1x2x8xf32, #tpu.memory_space<vmem>>, vector<1x1x2x8xf32>
      tpu.vector_store %arg11[%c0_89, %c0_90, %c0_91, %c0_92], %135 {strides = array<i32>} : memref<1x1x2x8xf32, #tpu.memory_space<vmem>>, vector<1x1x2x8xf32>,
    } else {
    }
    %c0_80 = arith.constant 0 : index
    %c0_81 = arith.constant 0 : index
    %c0_82 = arith.constant 0 : index
    %c0_83 = arith.constant 0 : index
    %132 = vector.load %arg11[%c0_80, %c0_81, %c0_82, %c0_83] : memref<1x1x2x8xf32, #tpu.memory_space<vmem>>, vector<1x1x2x8xf32>
    %133 = arith.addf %132, %128 : vector<1x1x2x8xf32>
    %c0_84 = arith.constant 0 : index
    %c0_85 = arith.constant 0 : index
    %c0_86 = arith.constant 0 : index
    %c0_87 = arith.constant 0 : index
    %134 = vector.load %arg11[%c0_84, %c0_85, %c0_86, %c0_87] : memref<1x1x2x8xf32, #tpu.memory_space<vmem>>, vector<1x1x2x8xf32>
    tpu.vector_store %arg11[%c0_84, %c0_85, %c0_86, %c0_87], %133 {strides = array<i32>} : memref<1x1x2x8xf32, #tpu.memory_space<vmem>>, vector<1x1x2x8xf32>,
    return
  }
  func.func @transform_0(%arg0: i32, %arg1: i32, %arg2: i32) -> (i32, i32, i32, i32) {
    %c2_i32 = arith.constant 2 : i32
    %0 = arith.muli %arg1, %c2_i32 : i32
    %1 = arith.addi %0, %arg2 : i32
    %c4_i32 = arith.constant 4 : i32
    %2 = arith.muli %1, %c4_i32 : i32
    %c1_i32 = arith.constant 1 : i32
    %3 = arith.subi %2, %c1_i32 : i32
    %c0_i32 = arith.constant 0 : i32
    %4 = arith.maxsi %3, %c0_i32 : i32
    %c0_i32_0 = arith.constant 0 : i32
    %c0_i32_1 = arith.constant 0 : i32
    %c0_i32_2 = arith.constant 0 : i32
    return %arg0, %4, %c0_i32_0, %c0_i32_1 : i32, i32, i32, i32
  }
  func.func @transform_1(%arg0: i32, %arg1: i32, %arg2: i32) -> (i32, i32, i32, i32) {
    %c2_i32 = arith.constant 2 : i32
    %0 = arith.muli %arg1, %c2_i32 : i32
    %1 = arith.addi %0, %arg2 : i32
    %c0_i32 = arith.constant 0 : i32
    %c0_i32_0 = arith.constant 0 : i32
    %c0_i32_1 = arith.constant 0 : i32
    return %arg0, %1, %c0_i32, %c0_i32_0 : i32, i32, i32, i32
  }
  func.func @transform_2(%arg0: i32, %arg1: i32, %arg2: i32) -> (i32, i32, i32, i32) {
    %c2_i32 = arith.constant 2 : i32
    %0 = arith.muli %arg1, %c2_i32 : i32
    %1 = arith.addi %0, %arg2 : i32
    %c4_i32 = arith.constant 4 : i32
    %2 = arith.muli %1, %c4_i32 : i32
    %c4_i32_0 = arith.constant 4 : i32
    %3 = arith.addi %2, %c4_i32_0 : i32
    %c15_i32 = arith.constant 15 : i32
    %4 = arith.minsi %3, %c15_i32 : i32
    %c0_i32 = arith.constant 0 : i32
    %c0_i32_1 = arith.constant 0 : i32
    %c0_i32_2 = arith.constant 0 : i32
    return %arg0, %4, %c0_i32, %c0_i32_1 : i32, i32, i32, i32
  }
  func.func @transform_3(%arg0: i32, %arg1: i32, %arg2: i32) -> (i32, i32, i32) {
    %c0_i32 = arith.constant 0 : i32
    %c0_i32_0 = arith.constant 0 : i32
    %c0_i32_1 = arith.constant 0 : i32
    %c0_i32_2 = arith.constant 0 : i32
    return %c0_i32, %c0_i32_0, %c0_i32_1 : i32, i32, i32
  }
  func.func @transform_4(%arg0: i32, %arg1: i32, %arg2: i32) -> (i32, i32) {
    %c0_i32 = arith.constant 0 : i32
    %c0_i32_0 = arith.constant 0 : i32
    %c0_i32_1 = arith.constant 0 : i32
    return %c0_i32, %c0_i32_0 : i32, i32
  }
  func.func @transform_5(%arg0: i32, %arg1: i32, %arg2: i32) -> (i32, i32) {
    %c0_i32 = arith.constant 0 : i32
    %c0_i32_0 = arith.constant 0 : i32
    %c0_i32_1 = arith.constant 0 : i32
    return %c0_i32, %c0_i32_0 : i32, i32
  }
  func.func @transform_6(%arg0: i32, %arg1: i32, %arg2: i32) -> (i32, i32) {
    %c0_i32 = arith.constant 0 : i32
    %c0_i32_0 = arith.constant 0 : i32
    %c0_i32_1 = arith.constant 0 : i32
    return %c0_i32, %c0_i32_0 : i32, i32
  }
  func.func @transform_7(%arg0: i32, %arg1: i32, %arg2: i32) -> (i32, i32, i32, i32) {
    %c2_i32 = arith.constant 2 : i32
    %0 = arith.muli %arg1, %c2_i32 : i32
    %1 = arith.addi %0, %arg2 : i32
    %c0_i32 = arith.constant 0 : i32
    %c0_i32_0 = arith.constant 0 : i32
    %c0_i32_1 = arith.constant 0 : i32
    return %arg0, %1, %c0_i32, %c0_i32_0 : i32, i32, i32, i32
  }
  func.func @transform_8(%arg0: i32, %arg1: i32, %arg2: i32) -> (i32, i32, i32, i32) {
    %c0_i32 = arith.constant 0 : i32
    %c0_i32_0 = arith.constant 0 : i32
    %c0_i32_1 = arith.constant 0 : i32
    return %arg0, %arg1, %c0_i32, %c0_i32_0 : i32, i32, i32, i32
  }
}

</mosaic_0001>

<bundles_post_ra>
// kernel: conv3x3_forward.5
= control target key start
LH: loop header
LB: loop body
LE: loop exit
PB: predicated region body
PF: predicated region fallthrough
CT: control target
= control target key end

     0   :  { %vm348_vm0 = vcmask 64512   ;;  %s1088_s0 = inlined_call_operand.vmem [shape: bf16[32,16,8], index: 0, kind: input, shape index: {}]   ;;  %s1089_s1 = inlined_call_operand.vmem [shape: f32[1,8], index: 1, kind: input, shape index: {}]   ;;  %s1090_s2 = inlined_call_operand.vmem [shape: f32[1,8], index: 2, kind: input, shape index: {}]   ;;  %s1091_s3 = inlined_call_operand.vmem [shape: f32[32,16,8], index: 3, kind: output, shape index: {}]  }
   0x1   :  { %v420_v0 = vld [vmem:[%s1088_s0] sm:$0xff]   ;;  %v547_v4 = vld [vmem:[%s1088_s0 + $0x8] sm:$0xff]   ;;  %v548_v5 = vld [vmem:[%s1088_s0 + $0x10] sm:$0xff]  }
   0x2   :  { %v604_v1 = vld [vmem:[%s1089_s1] ss:$0 sm:$0xff]  ;;  %v421_v2 = vunpack.c.l.bf16 %v420_v0  ;;  %v422_v3 = vunpack.c.h.bf16 %v420_v0  ;;  %v549_v6 = vld [vmem:[%s1088_s0 + $0x18] sm:$0xff]   ;;  %v425_v8 = vunpack.c.l.bf16 %v547_v4  ;;  %v426_v9 = vunpack.c.h.bf16 %v547_v4  ;;  %v551_v33 = vld [vmem:[%s1088_s0 + $0x28] sm:$0xff]  }
   0x3   :  { %v618_v7 = vld [vmem:[%s1090_s2] ss:$0 sm:$0xff]  ;;  %v429_v10 = vunpack.c.l.bf16 %v548_v5  ;;  %v430_v11 = vunpack.c.h.bf16 %v548_v5  ;;  %v433_v14 = vunpack.c.l.bf16 %v549_v6  ;;  %v434_v15 = vunpack.c.h.bf16 %v549_v6  ;;  %v552_v34 = vld [vmem:[%s1088_s0 + $0x30] sm:$0xff]   ;;  %v553_v39 = vld [vmem:[%s1088_s0 + $0x38] sm:$0xff]  }
   0x4   :  { %v149_v12 = vmul.f32 %v421_v2, %v604_v1  ;;  %v150_v13 = vmul.f32 %v422_v3, %v604_v1  ;;  %v151_v16 = vmul.f32 %v425_v8, %v604_v1  ;;  %v152_v17 = vmul.f32 %v426_v9, %v604_v1  ;;  %v550_v28 = vld [vmem:[%s1088_s0 + $0x20] sm:$0xff]   ;;  %v555_v6 = vld [vmem:[%s1088_s0 + $0x48] sm:$0xff]   ;;  %v556_v8 = vld [vmem:[%s1088_s0 + $0x50] sm:$0xff]  }
   0x5   :  { %v153_v18 = vmul.f32 %v429_v10, %v604_v1  ;;  %v154_v19 = vmul.f32 %v430_v11, %v604_v1  ;;  %v155_v22 = vmul.f32 %v433_v14, %v604_v1  ;;  %v156_v23 = vmul.f32 %v434_v15, %v604_v1  ;;  %v554_v0 = vld [vmem:[%s1088_s0 + $0x40] sm:$0xff]  }
   0x6   :  { %v220_v20 = vadd.f32 %v618_v7, %v149_v12  ;;  %v221_v21 = vadd.f32 %v618_v7, %v150_v13  ;;  %v222_v24 = vadd.f32 %v618_v7, %v151_v16  ;;  %v223_v25 = vadd.f32 %v618_v7, %v152_v17  ;;  %v557_v13 = vld [vmem:[%s1088_s0 + $0x58] sm:$0xff]  }
   0x7   :  { %v224_v26 = vadd.f32 %v618_v7, %v153_v18  ;;  %v225_v27 = vadd.f32 %v618_v7, %v154_v19  ;;  %v226_v31 = vadd.f32 %v618_v7, %v155_v22  ;;  %v227_v32 = vadd.f32 %v618_v7, %v156_v23 }
   0x8   :  { %v284_v29 = vmax.f32 %v220_v20, 0.0  ;;  %v285_v30 = vmax.f32 %v221_v21, 0.0  ;;  %v286_v35 = vmax.f32 %v222_v24, 0.0  ;;  %v287_v36 = vmax.f32 %v223_v25, 0.0 }
   0x9   :  { %v288_v37 = vmax.f32 %v224_v26, 0.0  ;;  %v289_v38 = vmax.f32 %v225_v27, 0.0  ;;  %v290_v40 = vmax.f32 %v226_v31, 0.0  ;;  %v291_v41 = vmax.f32 %v227_v32, 0.0 }
   0xa   :  { %349 = vst.msk [vmem:[%s1091_s3] sm:$0xff] %vm348_vm0, %v284_v29  ;;  %350 = vst.msk [vmem:[%s1091_s3 + $0x8] sm:$0xff] %vm348_vm0, %v285_v30  ;;  %v437_v42 = vunpack.c.l.bf16 %v550_v28  ;;  %v438_v43 = vunpack.c.h.bf16 %v550_v28  ;;  %v441_v44 = vunpack.c.l.bf16 %v551_v33  ;;  %v442_v45 = vunpack.c.h.bf16 %v551_v33 }
   0xb   :  { %351 = vst.msk [vmem:[%s1091_s3 + $0x10] sm:$0xff] %vm348_vm0, %v286_v35  ;;  %352 = vst.msk [vmem:[%s1091_s3 + $0x18] sm:$0xff] %vm348_vm0, %v287_v36  ;;  %v445_v46 = vunpack.c.l.bf16 %v552_v34  ;;  %v446_v47 = vunpack.c.h.bf16 %v552_v34  ;;  %v449_v50 = vunpack.c.l.bf16 %v553_v39  ;;  %v450_v51 = vunpack.c.h.bf16 %v553_v39 }
   0xc   :  { %353 = vst.msk [vmem:[%s1091_s3 + $0x20] sm:$0xff] %vm348_vm0, %v288_v37  ;;  %354 = vst.msk [vmem:[%s1091_s3 + $0x28] sm:$0xff] %vm348_vm0, %v289_v38  ;;  %v157_v48 = vmul.f32 %v437_v42, %v604_v1  ;;  %v158_v49 = vmul.f32 %v438_v43, %v604_v1  ;;  %v159_v52 = vmul.f32 %v441_v44, %v604_v1  ;;  %v453_v16 = vunpack.c.l.bf16 %v554_v0  ;;  %v558_v38 = vld [vmem:[%s1088_s0 + $0x60] sm:$0xff]   ;;  %v559_v43 = vld [vmem:[%s1088_s0 + $0x68] sm:$0xff]  }
   0xd   :  { %355 = vst.msk [vmem:[%s1091_s3 + $0x30] sm:$0xff] %vm348_vm0, %v290_v40  ;;  %356 = vst.msk [vmem:[%s1091_s3 + $0x38] sm:$0xff] %vm348_vm0, %v291_v41  ;;  %v160_v53 = vmul.f32 %v442_v45, %v604_v1  ;;  %v161_v54 = vmul.f32 %v445_v46, %v604_v1  ;;  %v162_v55 = vmul.f32 %v446_v47, %v604_v1  ;;  %v454_v17 = vunpack.c.h.bf16 %v554_v0  ;;  %v560_v44 = vld [vmem:[%s1088_s0 + $0x70] sm:$0xff]  }
   0xe   :  { %v228_v56 = vadd.f32 %v618_v7, %v157_v48  ;;  %v229_v57 = vadd.f32 %v618_v7, %v158_v49  ;;  %v163_v58 = vmul.f32 %v449_v50, %v604_v1  ;;  %v164_v59 = vmul.f32 %v450_v51, %v604_v1  ;;  %v561_v49 = vld [vmem:[%s1088_s0 + $0x78] sm:$0xff]  }
   0xf   :  { %v230_v60 = vadd.f32 %v618_v7, %v159_v52  ;;  %v231_v61 = vadd.f32 %v618_v7, %v160_v53  ;;  %v232_v62 = vadd.f32 %v618_v7, %v161_v54  ;;  %v233_v63 = vadd.f32 %v618_v7, %v162_v55 }
  0x10   :  { %v292_v2 = vmax.f32 %v228_v56, 0.0  ;;  %v293_v3 = vmax.f32 %v229_v57, 0.0  ;;  %v234_v4 = vadd.f32 %v618_v7, %v163_v58  ;;  %v235_v5 = vadd.f32 %v618_v7, %v164_v59 }
  0x11   :  { %v294_v9 = vmax.f32 %v230_v60, 0.0  ;;  %v295_v10 = vmax.f32 %v231_v61, 0.0  ;;  %v296_v11 = vmax.f32 %v232_v62, 0.0  ;;  %v297_v12 = vmax.f32 %v233_v63, 0.0 }
  0x12   :  { %357 = vst.msk [vmem:[%s1091_s3 + $0x40] sm:$0xff] %vm348_vm0, %v292_v2  ;;  %358 = vst.msk [vmem:[%s1091_s3 + $0x48] sm:$0xff] %vm348_vm0, %v293_v3  ;;  %v298_v14 = vmax.f32 %v234_v4, 0.0  ;;  %v299_v15 = vmax.f32 %v235_v5, 0.0  ;;  %v457_v18 = vunpack.c.l.bf16 %v555_v6  ;;  %v458_v19 = vunpack.c.h.bf16 %v555_v6 }
  0x13   :  { %359 = vst.msk [vmem:[%s1091_s3 + $0x50] sm:$0xff] %vm348_vm0, %v294_v9  ;;  %360 = vst.msk [vmem:[%s1091_s3 + $0x58] sm:$0xff] %vm348_vm0, %v295_v10  ;;  %v461_v20 = vunpack.c.l.bf16 %v556_v8  ;;  %v462_v21 = vunpack.c.h.bf16 %v556_v8  ;;  %v165_v22 = vmul.f32 %v453_v16, %v604_v1  ;;  %v166_v23 = vmul.f32 %v454_v17, %v604_v1  ;;  %v563_v17 = vld [vmem:[%s1088_s0 + $0x88] sm:$0xff]  }
  0x14   :  { %361 = vst.msk [vmem:[%s1091_s3 + $0x60] sm:$0xff] %vm348_vm0, %v296_v11  ;;  %362 = vst.msk [vmem:[%s1091_s3 + $0x68] sm:$0xff] %vm348_vm0, %v297_v12  ;;  %v465_v24 = vunpack.c.l.bf16 %v557_v13  ;;  %v466_v25 = vunpack.c.h.bf16 %v557_v13  ;;  %v167_v26 = vmul.f32 %v457_v18, %v604_v1  ;;  %v168_v27 = vmul.f32 %v458_v19, %v604_v1  ;;  %v562_v12 = vld [vmem:[%s1088_s0 + $0x80] sm:$0xff]   ;;  %v564_v18 = vld [vmem:[%s1088_s0 + $0x90] sm:$0xff]  }
  0x15   :  { %363 = vst.msk [vmem:[%s1091_s3 + $0x70] sm:$0xff] %vm348_vm0, %v298_v14  ;;  %364 = vst.msk [vmem:[%s1091_s3 + $0x78] sm:$0xff] %vm348_vm0, %v299_v15  ;;  %v169_v28 = vmul.f32 %v461_v20, %v604_v1  ;;  %v170_v29 = vmul.f32 %v462_v21, %v604_v1  ;;  %v236_v30 = vadd.f32 %v618_v7, %v165_v22  ;;  %v469_v52 = vunpack.c.l.bf16 %v558_v38 }
  0x16   :  { %v237_v31 = vadd.f32 %v618_v7, %v166_v23  ;;  %v171_v32 = vmul.f32 %v465_v24, %v604_v1  ;;  %v172_v33 = vmul.f32 %v466_v25, %v604_v1  ;;  %v238_v34 = vadd.f32 %v618_v7, %v167_v26  ;;  %v565_v23 = vld [vmem:[%s1088_s0 + $0x98] sm:$0xff]  }
  0x17   :  { %v239_v35 = vadd.f32 %v618_v7, %v168_v27  ;;  %v240_v36 = vadd.f32 %v618_v7, %v169_v28  ;;  %v241_v37 = vadd.f32 %v618_v7, %v170_v29  ;;  %v300_v39 = vmax.f32 %v236_v30, 0.0 }
  0x18   :  { %v301_v40 = vmax.f32 %v237_v31, 0.0  ;;  %v242_v41 = vadd.f32 %v618_v7, %v171_v32  ;;  %v243_v42 = vadd.f32 %v618_v7, %v172_v33  ;;  %v302_v45 = vmax.f32 %v238_v34, 0.0 }
  0x19   :  { %v303_v46 = vmax.f32 %v239_v35, 0.0  ;;  %v304_v47 = vmax.f32 %v240_v36, 0.0  ;;  %v305_v48 = vmax.f32 %v241_v37, 0.0  ;;  %365 = vst.msk [vmem:[%s1091_s3 + $0x80] sm:$0xff] %vm348_vm0, %v300_v39  ;;  %v470_v53 = vunpack.c.h.bf16 %v558_v38 }
  0x1a   :  { %366 = vst.msk [vmem:[%s1091_s3 + $0x88] sm:$0xff] %vm348_vm0, %v301_v40  ;;  %v306_v50 = vmax.f32 %v242_v41, 0.0  ;;  %v307_v51 = vmax.f32 %v243_v42, 0.0  ;;  %367 = vst.msk [vmem:[%s1091_s3 + $0x90] sm:$0xff] %vm348_vm0, %v302_v45  ;;  %v473_v54 = vunpack.c.l.bf16 %v559_v43  ;;  %v474_v55 = vunpack.c.h.bf16 %v559_v43 }
  0x1b   :  { %368 = vst.msk [vmem:[%s1091_s3 + $0x98] sm:$0xff] %vm348_vm0, %v303_v46  ;;  %369 = vst.msk [vmem:[%s1091_s3 + $0xa0] sm:$0xff] %vm348_vm0, %v304_v47  ;;  %v477_v56 = vunpack.c.l.bf16 %v560_v44  ;;  %v478_v57 = vunpack.c.h.bf16 %v560_v44  ;;  %v173_v58 = vmul.f32 %v469_v52, %v604_v1  ;;  %v174_v59 = vmul.f32 %v470_v53, %v604_v1  ;;  %v567_v53 = vld [vmem:[%s1088_s0 + $0xa8] sm:$0xff]  }
  0x1c   :  { %370 = vst.msk [vmem:[%s1091_s3 + $0xa8] sm:$0xff] %vm348_vm0, %v305_v48  ;;  %371 = vst.msk [vmem:[%s1091_s3 + $0xb0] sm:$0xff] %vm348_vm0, %v306_v50  ;;  %v481_v60 = vunpack.c.l.bf16 %v561_v49  ;;  %v482_v61 = vunpack.c.h.bf16 %v561_v49  ;;  %v175_v62 = vmul.f32 %v473_v54, %v604_v1  ;;  %v176_v63 = vmul.f32 %v474_v55, %v604_v1  ;;  %v566_v48 = vld [vmem:[%s1088_s0 + $0xa0] sm:$0xff]   ;;  %v568_v54 = vld [vmem:[%s1088_s0 + $0xb0] sm:$0xff]  }
  0x1d   :  { %372 = vst.msk [vmem:[%s1091_s3 + $0xb8] sm:$0xff] %vm348_vm0, %v307_v51  ;;  %v177_v0 = vmul.f32 %v477_v56, %v604_v1  ;;  %v178_v2 = vmul.f32 %v478_v57, %v604_v1  ;;  %v244_v3 = vadd.f32 %v618_v7, %v173_v58  ;;  %v245_v4 = vadd.f32 %v618_v7, %v174_v59  ;;  %v569_v59 = vld [vmem:[%s1088_s0 + $0xb8] sm:$0xff]  }
  0x1e   :  { %v179_v5 = vmul.f32 %v481_v60, %v604_v1  ;;  %v180_v6 = vmul.f32 %v482_v61, %v604_v1  ;;  %v246_v8 = vadd.f32 %v618_v7, %v175_v62  ;;  %v247_v9 = vadd.f32 %v618_v7, %v176_v63 }
  0x1f   :  { %v248_v10 = vadd.f32 %v618_v7, %v177_v0  ;;  %v249_v11 = vadd.f32 %v618_v7, %v178_v2  ;;  %v308_v13 = vmax.f32 %v244_v3, 0.0  ;;  %v309_v14 = vmax.f32 %v245_v4, 0.0 }
  0x20   :  { %v250_v15 = vadd.f32 %v618_v7, %v179_v5  ;;  %v251_v16 = vadd.f32 %v618_v7, %v180_v6  ;;  %v310_v19 = vmax.f32 %v246_v8, 0.0  ;;  %v311_v20 = vmax.f32 %v247_v9, 0.0 }
  0x21   :  { %v312_v21 = vmax.f32 %v248_v10, 0.0  ;;  %v313_v22 = vmax.f32 %v249_v11, 0.0  ;;  %373 = vst.msk [vmem:[%s1091_s3 + $0xc0] sm:$0xff] %vm348_vm0, %v308_v13  ;;  %374 = vst.msk [vmem:[%s1091_s3 + $0xc8] sm:$0xff] %vm348_vm0, %v309_v14  ;;  %v485_v26 = vunpack.c.l.bf16 %v562_v12  ;;  %v486_v27 = vunpack.c.h.bf16 %v562_v12 }
  0x22   :  { %v314_v24 = vmax.f32 %v250_v15, 0.0  ;;  %v315_v25 = vmax.f32 %v251_v16, 0.0  ;;  %375 = vst.msk [vmem:[%s1091_s3 + $0xd0] sm:$0xff] %vm348_vm0, %v310_v19  ;;  %376 = vst.msk [vmem:[%s1091_s3 + $0xd8] sm:$0xff] %vm348_vm0, %v311_v20  ;;  %v489_v28 = vunpack.c.l.bf16 %v563_v17  ;;  %v490_v29 = vunpack.c.h.bf16 %v563_v17 }
  0x23   :  { %377 = vst.msk [vmem:[%s1091_s3 + $0xe0] sm:$0xff] %vm348_vm0, %v312_v21  ;;  %378 = vst.msk [vmem:[%s1091_s3 + $0xe8] sm:$0xff] %vm348_vm0, %v313_v22  ;;  %v493_v30 = vunpack.c.l.bf16 %v564_v18  ;;  %v494_v31 = vunpack.c.h.bf16 %v564_v18  ;;  %v181_v32 = vmul.f32 %v485_v26, %v604_v1  ;;  %v182_v33 = vmul.f32 %v486_v27, %v604_v1  ;;  %v570_v22 = vld [vmem:[%s1088_s0 + $0xc0] sm:$0xff]   ;;  %v571_v27 = vld [vmem:[%s1088_s0 + $0xc8] sm:$0xff]  }
  0x24   :  { %379 = vst.msk [vmem:[%s1091_s3 + $0xf0] sm:$0xff] %vm348_vm0, %v314_v24  ;;  %380 = vst.msk [vmem:[%s1091_s3 + $0xf8] sm:$0xff] %vm348_vm0, %v315_v25  ;;  %v497_v34 = vunpack.c.l.bf16 %v565_v23  ;;  %v498_v35 = vunpack.c.h.bf16 %v565_v23  ;;  %v183_v36 = vmul.f32 %v489_v28, %v604_v1  ;;  %v184_v37 = vmul.f32 %v490_v29, %v604_v1  ;;  %v572_v28 = vld [vmem:[%s1088_s0 + $0xd0] sm:$0xff]  }
  0x25   :  { %v185_v38 = vmul.f32 %v493_v30, %v604_v1  ;;  %v186_v39 = vmul.f32 %v494_v31, %v604_v1  ;;  %v252_v40 = vadd.f32 %v618_v7, %v181_v32  ;;  %v253_v41 = vadd.f32 %v618_v7, %v182_v33  ;;  %v573_v33 = vld [vmem:[%s1088_s0 + $0xd8] sm:$0xff]  }
  0x26   :  { %v187_v42 = vmul.f32 %v497_v34, %v604_v1  ;;  %v188_v43 = vmul.f32 %v498_v35, %v604_v1  ;;  %v254_v44 = vadd.f32 %v618_v7, %v183_v36  ;;  %v255_v45 = vadd.f32 %v618_v7, %v184_v37 }
  0x27   :  { %v256_v46 = vadd.f32 %v618_v7, %v185_v38  ;;  %v257_v47 = vadd.f32 %v618_v7, %v186_v39  ;;  %v316_v49 = vmax.f32 %v252_v40, 0.0  ;;  %v317_v50 = vmax.f32 %v253_v41, 0.0 }
  0x28   :  { %v258_v51 = vadd.f32 %v618_v7, %v187_v42  ;;  %v259_v52 = vadd.f32 %v618_v7, %v188_v43  ;;  %v318_v55 = vmax.f32 %v254_v44, 0.0  ;;  %v319_v56 = vmax.f32 %v255_v45, 0.0 }
  0x29   :  { %v320_v57 = vmax.f32 %v256_v46, 0.0  ;;  %v321_v58 = vmax.f32 %v257_v47, 0.0  ;;  %381 = vst.msk [vmem:[%s1091_s3 + $0x100] sm:$0xff] %vm348_vm0, %v316_v49  ;;  %382 = vst.msk [vmem:[%s1091_s3 + $0x108] sm:$0xff] %vm348_vm0, %v317_v50  ;;  %v501_v62 = vunpack.c.l.bf16 %v566_v48  ;;  %v502_v63 = vunpack.c.h.bf16 %v566_v48 }
  0x2a   :  { %v322_v60 = vmax.f32 %v258_v51, 0.0  ;;  %v323_v61 = vmax.f32 %v259_v52, 0.0  ;;  %383 = vst.msk [vmem:[%s1091_s3 + $0x110] sm:$0xff] %vm348_vm0, %v318_v55  ;;  %384 = vst.msk [vmem:[%s1091_s3 + $0x118] sm:$0xff] %vm348_vm0, %v319_v56  ;;  %v505_v0 = vunpack.c.l.bf16 %v567_v53  ;;  %v506_v2 = vunpack.c.h.bf16 %v567_v53 }
  0x2b   :  { %385 = vst.msk [vmem:[%s1091_s3 + $0x120] sm:$0xff] %vm348_vm0, %v320_v57  ;;  %386 = vst.msk [vmem:[%s1091_s3 + $0x128] sm:$0xff] %vm348_vm0, %v321_v58  ;;  %v509_v3 = vunpack.c.l.bf16 %v568_v54  ;;  %v510_v4 = vunpack.c.h.bf16 %v568_v54  ;;  %v189_v5 = vmul.f32 %v501_v62, %v604_v1  ;;  %v190_v6 = vmul.f32 %v502_v63, %v604_v1  ;;  %v574_v58 = vld [vmem:[%s1088_s0 + $0xe0] sm:$0xff]   ;;  %v575_v63 = vld [vmem:[%s1088_s0 + $0xe8] sm:$0xff]  }
  0x2c   :  { %387 = vst.msk [vmem:[%s1091_s3 + $0x130] sm:$0xff] %vm348_vm0, %v322_v60  ;;  %388 = vst.msk [vmem:[%s1091_s3 + $0x138] sm:$0xff] %vm348_vm0, %v323_v61  ;;  %v513_v8 = vunpack.c.l.bf16 %v569_v59  ;;  %v514_v9 = vunpack.c.h.bf16 %v569_v59  ;;  %v191_v10 = vmul.f32 %v505_v0, %v604_v1  ;;  %v192_v11 = vmul.f32 %v506_v2, %v604_v1  ;;  %v576_v0 = vld [vmem:[%s1088_s0 + $0xf0] sm:$0xff]  }
  0x2d   :  { %v193_v12 = vmul.f32 %v509_v3, %v604_v1  ;;  %v194_v13 = vmul.f32 %v510_v4, %v604_v1  ;;  %v260_v14 = vadd.f32 %v618_v7, %v189_v5  ;;  %v261_v15 = vadd.f32 %v618_v7, %v190_v6  ;;  %v577_v6 = vld [vmem:[%s1088_s0 + $0xf8] sm:$0xff]  }
  0x2e   :  { %v195_v16 = vmul.f32 %v513_v8, %v604_v1  ;;  %v196_v17 = vmul.f32 %v514_v9, %v604_v1  ;;  %v262_v18 = vadd.f32 %v618_v7, %v191_v10  ;;  %v263_v19 = vadd.f32 %v618_v7, %v192_v11 }
  0x2f   :  { %v264_v20 = vadd.f32 %v618_v7, %v193_v12  ;;  %v265_v21 = vadd.f32 %v618_v7, %v194_v13  ;;  %v324_v23 = vmax.f32 %v260_v14, 0.0  ;;  %v325_v24 = vmax.f32 %v261_v15, 0.0 }
  0x30   :  { %v266_v25 = vadd.f32 %v618_v7, %v195_v16  ;;  %v267_v26 = vadd.f32 %v618_v7, %v196_v17  ;;  %v326_v29 = vmax.f32 %v262_v18, 0.0  ;;  %v327_v30 = vmax.f32 %v263_v19, 0.0 }
  0x31   :  { %v328_v31 = vmax.f32 %v264_v20, 0.0  ;;  %v329_v32 = vmax.f32 %v265_v21, 0.0  ;;  %389 = vst.msk [vmem:[%s1091_s3 + $0x140] sm:$0xff] %vm348_vm0, %v324_v23  ;;  %390 = vst.msk [vmem:[%s1091_s3 + $0x148] sm:$0xff] %vm348_vm0, %v325_v24  ;;  %v517_v36 = vunpack.c.l.bf16 %v570_v22  ;;  %v518_v37 = vunpack.c.h.bf16 %v570_v22 }
  0x32   :  { %v330_v34 = vmax.f32 %v266_v25, 0.0  ;;  %v331_v35 = vmax.f32 %v267_v26, 0.0  ;;  %391 = vst.msk [vmem:[%s1091_s3 + $0x150] sm:$0xff] %vm348_vm0, %v326_v29  ;;  %392 = vst.msk [vmem:[%s1091_s3 + $0x158] sm:$0xff] %vm348_vm0, %v327_v30  ;;  %v521_v38 = vunpack.c.l.bf16 %v571_v27  ;;  %v522_v39 = vunpack.c.h.bf16 %v571_v27 }
  0x33   :  { %393 = vst.msk [vmem:[%s1091_s3 + $0x160] sm:$0xff] %vm348_vm0, %v328_v31  ;;  %394 = vst.msk [vmem:[%s1091_s3 + $0x168] sm:$0xff] %vm348_vm0, %v329_v32  ;;  %v525_v40 = vunpack.c.l.bf16 %v572_v28  ;;  %v526_v41 = vunpack.c.h.bf16 %v572_v28  ;;  %v197_v42 = vmul.f32 %v517_v36, %v604_v1  ;;  %v198_v43 = vmul.f32 %v518_v37, %v604_v1 }
  0x34   :  { %395 = vst.msk [vmem:[%s1091_s3 + $0x170] sm:$0xff] %vm348_vm0, %v330_v34  ;;  %396 = vst.msk [vmem:[%s1091_s3 + $0x178] sm:$0xff] %vm348_vm0, %v331_v35  ;;  %v529_v44 = vunpack.c.l.bf16 %v573_v33  ;;  %v530_v45 = vunpack.c.h.bf16 %v573_v33  ;;  %v199_v46 = vmul.f32 %v521_v38, %v604_v1  ;;  %v200_v47 = vmul.f32 %v522_v39, %v604_v1 }
  0x35   :  { %v201_v48 = vmul.f32 %v525_v40, %v604_v1  ;;  %v202_v49 = vmul.f32 %v526_v41, %v604_v1  ;;  %v268_v50 = vadd.f32 %v618_v7, %v197_v42  ;;  %v269_v51 = vadd.f32 %v618_v7, %v198_v43 }
  0x36   :  { %v203_v52 = vmul.f32 %v529_v44, %v604_v1  ;;  %v204_v53 = vmul.f32 %v530_v45, %v604_v1  ;;  %v270_v54 = vadd.f32 %v618_v7, %v199_v46  ;;  %v271_v55 = vadd.f32 %v618_v7, %v200_v47 }
  0x37   :  { %v272_v56 = vadd.f32 %v618_v7, %v201_v48  ;;  %v273_v57 = vadd.f32 %v618_v7, %v202_v49  ;;  %v332_v59 = vmax.f32 %v268_v50, 0.0  ;;  %v333_v60 = vmax.f32 %v269_v51, 0.0 }
  0x38   :  { %v274_v61 = vadd.f32 %v618_v7, %v203_v52  ;;  %v275_v62 = vadd.f32 %v618_v7, %v204_v53  ;;  %v334_v2 = vmax.f32 %v270_v54, 0.0  ;;  %v335_v3 = vmax.f32 %v271_v55, 0.0 }
  0x39   :  { %v336_v4 = vmax.f32 %v272_v56, 0.0  ;;  %v337_v5 = vmax.f32 %v273_v57, 0.0  ;;  %397 = vst.msk [vmem:[%s1091_s3 + $0x180] sm:$0xff] %vm348_vm0, %v332_v59  ;;  %398 = vst.msk [vmem:[%s1091_s3 + $0x188] sm:$0xff] %vm348_vm0, %v333_v60  ;;  %v533_v10 = vunpack.c.l.bf16 %v574_v58  ;;  %v534_v11 = vunpack.c.h.bf16 %v574_v58 }
  0x3a   :  { %v338_v8 = vmax.f32 %v274_v61, 0.0  ;;  %v339_v9 = vmax.f32 %v275_v62, 0.0  ;;  %399 = vst.msk [vmem:[%s1091_s3 + $0x190] sm:$0xff] %vm348_vm0, %v334_v2  ;;  %400 = vst.msk [vmem:[%s1091_s3 + $0x198] sm:$0xff] %vm348_vm0, %v335_v3  ;;  %v537_v12 = vunpack.c.l.bf16 %v575_v63  ;;  %v538_v13 = vunpack.c.h.bf16 %v575_v63 }
  0x3b   :  { %401 = vst.msk [vmem:[%s1091_s3 + $0x1a0] sm:$0xff] %vm348_vm0, %v336_v4  ;;  %402 = vst.msk [vmem:[%s1091_s3 + $0x1a8] sm:$0xff] %vm348_vm0, %v337_v5  ;;  %v541_v14 = vunpack.c.l.bf16 %v576_v0  ;;  %v542_v15 = vunpack.c.h.bf16 %v576_v0  ;;  %v205_v16 = vmul.f32 %v533_v10, %v604_v1  ;;  %v206_v17 = vmul.f32 %v534_v11, %v604_v1 }
  0x3c   :  { %403 = vst.msk [vmem:[%s1091_s3 + $0x1b0] sm:$0xff] %vm348_vm0, %v338_v8  ;;  %404 = vst.msk [vmem:[%s1091_s3 + $0x1b8] sm:$0xff] %vm348_vm0, %v339_v9  ;;  %v545_v18 = vunpack.c.l.bf16 %v577_v6  ;;  %v546_v19 = vunpack.c.h.bf16 %v577_v6  ;;  %v207_v20 = vmul.f32 %v537_v12, %v604_v1  ;;  %v208_v21 = vmul.f32 %v538_v13, %v604_v1 }
  0x3d   :  { %v209_v22 = vmul.f32 %v541_v14, %v604_v1  ;;  %v210_v23 = vmul.f32 %v542_v15, %v604_v1  ;;  %v276_v24 = vadd.f32 %v618_v7, %v205_v16  ;;  %v277_v25 = vadd.f32 %v618_v7, %v206_v17 }
  0x3e   :  { %v211_v26 = vmul.f32 %v545_v18, %v604_v1  ;;  %v212_v27 = vmul.f32 %v546_v19, %v604_v1  ;;  %v278_v28 = vadd.f32 %v618_v7, %v207_v20  ;;  %v279_v29 = vadd.f32 %v618_v7, %v208_v21 }
  0x3f   :  { %v280_v30 = vadd.f32 %v618_v7, %v209_v22  ;;  %v281_v31 = vadd.f32 %v618_v7, %v210_v23  ;;  %v340_v32 = vmax.f32 %v276_v24, 0.0  ;;  %v341_v33 = vmax.f32 %v277_v25, 0.0 }
  0x40   :  { %v282_v34 = vadd.f32 %v618_v7, %v211_v26  ;;  %v283_v35 = vadd.f32 %v618_v7, %v212_v27  ;;  %v342_v36 = vmax.f32 %v278_v28, 0.0  ;;  %v343_v37 = vmax.f32 %v279_v29, 0.0 }
  0x41   :  { %v344_v38 = vmax.f32 %v280_v30, 0.0  ;;  %v345_v39 = vmax.f32 %v281_v31, 0.0  ;;  %405 = vst.msk [vmem:[%s1091_s3 + $0x1c0] sm:$0xff] %vm348_vm0, %v340_v32  ;;  %406 = vst.msk [vmem:[%s1091_s3 + $0x1c8] sm:$0xff] %vm348_vm0, %v341_v33 }
  0x42   :  { %v346_v1 = vmax.f32 %v282_v34, 0.0  ;;  %v347_v40 = vmax.f32 %v283_v35, 0.0  ;;  %407 = vst.msk [vmem:[%s1091_s3 + $0x1d0] sm:$0xff] %vm348_vm0, %v342_v36  ;;  %408 = vst.msk [vmem:[%s1091_s3 + $0x1d8] sm:$0xff] %vm348_vm0, %v343_v37 }
  0x43   :  { %409 = vst.msk [vmem:[%s1091_s3 + $0x1e0] sm:$0xff] %vm348_vm0, %v344_v38  ;;  %410 = vst.msk [vmem:[%s1091_s3 + $0x1e8] sm:$0xff] %vm348_vm0, %v345_v39 }
  0x44   :  { %411 = vst.msk [vmem:[%s1091_s3 + $0x1f0] sm:$0xff] %vm348_vm0, %v346_v1  ;;  %412 = vst.msk [vmem:[%s1091_s3 + $0x1f8] sm:$0xff] %vm348_vm0, %v347_v40 }

// kernel: conv3x3_forward.3
= control target key start
LH: loop header
LB: loop body
LE: loop exit
PB: predicated region body
PF: predicated region fallthrough
CT: control target
= control target key end

     0   :  { %s1960_s27 = smov 0   ;;  %s1962_s28 = smov 0   ;;  %s2371_s0 = inlined_call_operand.vmem [shape: f32[2,16,16,4], index: 0, kind: input, shape index: {}, may-alias: {0,1,2}]   ;;  %s2372_s1 = inlined_call_operand.vmem [shape: f32[2,16,16,4], index: 1, kind: input, shape index: {}, may-alias: {0,1,2}]   ;;  %s2373_s2 = inlined_call_operand.vmem [shape: f32[2,16,16,4], index: 2, kind: input, shape index: {}, may-alias: {0,1,2}]   ;;  %s2374_s3 = inlined_call_operand.vmem [shape: bf16[3,12,8], index: 3, kind: input, shape index: {}]   ;;  %s2375_s4 = inlined_call_operand.vmem [shape: f32[1,8], index: 4, kind: input, shape index: {}]   ;;  %s2376_s5 = inlined_call_operand.vmem [shape: f32[1,4], index: 5, kind: input, shape index: {}]   ;;  %s2377_s6 = inlined_call_operand.vmem [shape: f32[1,4], index: 6, kind: input, shape index: {}]   ;;  %s2378_s7 = inlined_call_operand.vmem [shape: bf16[2,16,16,8], index: 7, kind: output, shape index: {0}]   ;;  %s2379_s8 = inlined_call_operand.vmem [shape: f32[2,2,2,8], index: 8, kind: output, shape index: {1}]  }
   0x1   :  { %s1964_s29 = smov 0   ;;  %s1966_s30 = smov 0  }
   0x2   :  { %s1968_s9 = smov 0   ;;  %s1970_s5 = smov 0  }
   0x3   :  { %s1972_s10 = smov 0  }
   0x4 LB: > { %s31_s6 = sadd.s32 1, %s1898_s30  ;;  %s34_s11 = sadd.s32 1, %s1902_s9  ;;  %s1910_s10 = sphi %s1972_s10, %s19_s10   ;;  %s1906_s5 = sphi %s1970_s5, %s2386_s5   ;;  %s1902_s9 = sphi %s1968_s9, %s2385_s9   ;;  %s1898_s30 = sphi %s1966_s30, %s2384_s30   ;;  %s1894_s29 = sphi %s1964_s29, %s2383_s29   ;;  %s1890_s28 = sphi %s1962_s28, %s2382_s28   ;;  %s1886_s27 = sphi %s1960_s27, %s2381_s27  }
   0x5   : > { %p32_p0 = scmp.ge.s32.totalorder %s31_s6, 2  ;;  %p1549_p1 = scmp.ge.s32.totalorder %s1910_s10, 1 }
   0x6   : > { %p388_p2 = scmp.lt.s32.totalorder %s1910_s10, 9  ;;  %s38_s12 = sadd.s32 1, %s1906_s5 }
   0x7   : > { %s2388_s6 = smov (%p32_p0, %s31_s6), 0  ;;  %s2390_s11 = smov (!%p32_p0, %s34_s11), %s1902_s9 }
   0x8   : > { %p389_p3 = pnand %p1549_p1, %p388_p2  ;;  %p36_p4 = scmp.ge.s32.totalorder %s2390_s11, 2 }
   0x9   : > { %s1550_s13 = sshll.u32 (!%p389_p3), %s1890_s28, 1  ;;  %p480_p6 = scmp.lt.s32.totalorder (!%p389_p3), %s1894_s29, 1 }
   0xa   : > { %s2392_s11 = smov (%p36_p4, %s2390_s11), 0  ;;  %s2394_s12 = smov (!%p36_p4, %s38_s12), %s1906_s5 }
   0xb   : > { %p40_p5 = scmp.ge.s32.totalorder %s2394_s12, 2  ;;  %392 = sbr.rel (%p389_p3) target bundleno = 421 (0x1a5), region = 48 }
   0xc   : > { %s2008_s14 = sadd.s32 (!%p389_p3), %s1886_s27, %s1550_s13  ;;  %p548_p7 = scmp.lt.s32.totalorder (!%p389_p3), %s1890_s28, 1 }
   0xd   : > { %s2396_s12 = smov (%p40_p5, %s2394_s12), 0  ;;  %s2011_s15 = sshll.u32 (!%p389_p3), %s2008_s14, 2 }
   0xe   : > { %p500_p8 = scmp.lt.s32.totalorder (!%p389_p3), %s2011_s15, 15  ;;  %s2025_s20 = sadd.s32 (!%p389_p3), 4294967295, %s2011_s15 }
   0xf   : > { %p478_p9 = scmp.gt.s32.totalorder (!%p389_p3), %s2025_s20, 0  ;;  %p1553_p10 = scmp.lt.s32.totalorder (!%p389_p3), %s2025_s20, 15 }
  0x10   : > { %v557_v0 = vlaneseq  ;;  %s2398_s29 = smov (!%p480_p6, %s1894_s29), 1  ;;  %s2400_s28 = smov (!%p548_p7, %s1890_s28), 1  ;;  %v1841_v49 = vld [vmem:[%s2374_s3 + $0x8] sm:$0x3f]   ;;  %vm914_vm4 = vcmask 1045504   ;;  %vm610_vm5 = vcmask 31744  }
  0x11   : > { %s2017_s16 = sshll.u32 %s2398_s29, 5  ;;  %s1579_s17 = sshll.u32 %s2398_s29, 1  ;;  %1707 = vmatprep.subr.msk.bf16.mxu1 %vm914_vm4, %v1841_v49  ;;  %1706 = vmatprep.subr.msk.bf16.mxu0 %vm914_vm4, %v1841_v49  ;;  %vm613_vm6 = vcmask 64512   ;;  %vm624_vm7 = vcmask 93184   ;;  %vm901_vm8 = vcmask 97280   ;;  %vm1260_vm9 = vcmask 60416  }
  0x12   : > { %v2015_v1 = vshrl.u32 %v557_v0, 7  ;;  %s501_s18 = scalar_select %p500_p8, %s2011_s15, 15  ;;  %v916_v0 = vsel %vm914_vm4, %v1841_v49, 0  ;;  %vm1319_vm10 = vcmask 1040384  }
  0x13   : > { %s551_s22 = sadd.s32 %s1579_s17, %s2400_s28  ;;  %p562_p11 = scmp.gt.s32.totalorder %s2008_s14, 0  ;;  %1705 = vmatpush3.bf16.msra.mxu1 %v916_v0  ;;  %1675 = vmatpush3.bf16.msra.mxu0 %v916_v0 }
  0x14   : > { %s1563_s19 = sshll.u32 %s501_s18, 1  ;;  %v2022_v2 = vadd.s32 8, %v2015_v1  ;;  %vm572_vm0 = vcmp.lt.s32.totalorder %v2015_v1, 1  ;;  %vm585_vm1 = vcmp.lt.s32.totalorder %v2015_v1, 7  ;;  %s1580_s29 = sshll.u32 %s551_s22, 1  ;;  %vm568_vm3 = vcmp.ge.s32.totalorder %v2015_v1, 1 }
  0x15   : > { %s2028_s21 = sadd.s32 %s1563_s19, %s2017_s16  ;;  %s2048_s17 = scalar_lea.vmem %s2379_s8, %s1580_s29 }
  0x16   : > { %s1565_s23 = sshll.u32 %s2028_s21, 3  ;;  %vm582_vm2 = vcmp.lt.s32.totalorder %v2022_v2, 15  ;;  %s1912_s19 = smov 4  }
  0x17   : > { %s506_s26 = scalar_lea.vmem %s2372_s1, %s1565_s23  ;;  %s513_s22 = sadd.s32 4, %s2011_s15 }
  0x18   : > { %v2036_v3 = vld [vmem:[%s506_s26 + $0x20] sm:$0xff]  ;;  %v2038_v4 = vld [vmem:[%s506_s26 + $0x28] sm:$0xff]  ;;  %v2057_v11 = vld [vmem:[%s506_s26 + $0x30] sm:$0xff]  ;;  %s479_s18 = scalar_select %p478_p9, %s2025_s20, 0 }
  0x19   : > { %v2040_v5 = vld [vmem:[%s506_s26] sm:$0xff]  ;;  %v641_v6 = vrot.slane %v2038_v4, 7  ;;  %v665_v7 = vrot.slane %v2038_v4, 1  ;;  %v1769_v8 = vpack.i.bf16 %v2038_v4, %v2036_v3  ;;  %v637_v9 = vrot.slane %v2036_v3, 7  ;;  %v2055_v10 = vld [vmem:[%s506_s26 + $0x8] sm:$0xff]  ;;  %v2059_v12 = vld [vmem:[%s506_s26 + $0x38] sm:$0xff] }
  0x1a   : > { %v661_v13 = vrot.slane %v2036_v3, 1  ;;  %v639_v14 = vrot.slane %v2055_v10, 7  ;;  %v663_v15 = vrot.slane %v2055_v10, 1  ;;  %v1779_v16 = vpack.i.bf16 %v2055_v10, %v2040_v5  ;;  %v629_v17 = vld [vmem:[%s506_s26 + $0x10] sm:$0xff]  ;;  %v630_v18 = vld [vmem:[%s506_s26 + $0x18] sm:$0xff]  ;;  %s2402_s18 = smov (!%p1553_p10, %s479_s18), 15 }
  0x1b   : > { %1770 = vrot.lane.b32.xlu0 %v1769_v8, %s1912_s19  ;;  %v635_v19 = vrot.slane %v2040_v5, 7  ;;  %v659_v20 = vrot.slane %v2040_v5, 1  ;;  %v642_v21 = vrot.slane %v2059_v12, 7  ;;  %v666_v22 = vrot.slane %v2059_v12, 1  ;;  %s1558_s20 = sshll.u32 %s2402_s18, 1  ;;  %p2101_p12 = scmp.lt.s32.totalorder %s513_s22, 15 }
  0x1c   : > { %1780 = vrot.lane.b32.xlu1 %v1779_v16, %s1912_s19  ;;  %v1774_v23 = vpack.i.bf16 %v2059_v12, %v2057_v11  ;;  %v638_v24 = vrot.slane %v2057_v11, 7  ;;  %v662_v25 = vrot.slane %v2057_v11, 1  ;;  %v640_v26 = vrot.slane %v630_v18, 7  ;;  %s486_s24 = sadd.s32 %s2017_s16, %s1558_s20  ;;  %p806_p13 = scmp.lt.s32.totalorder %s2008_s14, 3 }
  0x1d   : > { %v664_v27 = vrot.slane %v630_v18, 1  ;;  %v1784_v28 = vpack.i.bf16 %v630_v18, %v629_v17  ;;  %v636_v29 = vrot.slane %v629_v17, 7  ;;  %v660_v30 = vrot.slane %v629_v17, 1  ;;  %s1560_s25 = sshll.u32 %s486_s24, 3  ;;  %s1913_s20 = smov 8  }
  0x1e   : > { %v670_v31 = vsel %vm585_vm1, %v662_v25, %v666_v22  ;;  %v674_v32 = vsel %vm585_vm1, %v666_v22, %v662_v25  ;;  %v669_v33 = vsel %vm585_vm1, %v661_v13, %v665_v7  ;;  %v673_v34 = vsel %vm585_vm1, %v665_v7, %v661_v13  ;;  %s488_s28 = scalar_lea.vmem %s2371_s0, %s1560_s25  ;;  %s2404_s22 = smov (!%p2101_p12, %s513_s22), 15  ;;  %v1846_v7 = vld [vmem:[%s2374_s3 + $0x10] sm:$0x3f]  }
  0x1f   : > { %1775 = vrot.lane.b32.xlu0 %v1774_v23, %s1912_s19  ;;  %v682_v35 = vsel %vm582_vm2, %v674_v32, 0.0  ;;  %v680_v36 = vsel %vm582_vm2, %v673_v34, 0.0  ;;  %v668_v37 = vsel %vm585_vm1, %v660_v30, %v664_v27  ;;  %v672_v38 = vsel %vm585_vm1, %v664_v27, %v660_v30  ;;  %s1830_s24 = scalar_select %p562_p11, 255, 0  ;;  %1709 = vmatprep.subr.msk.bf16.mxu0 %vm914_vm4, %v1846_v7 }
  0x20   : > { %1785 = vrot.lane.b32.xlu1 %v1784_v28, %s1912_s19  ;;  %v1794_v39 = vpack.i.bf16 %v682_v35, %v670_v31  ;;  %v1789_v40 = vpack.i.bf16 %v680_v36, %v669_v33  ;;  %v678_v41 = vsel %vm582_vm2, %v672_v38, 0.0  ;;  %v667_v42 = vsel %vm585_vm1, %v659_v20, %v663_v15  ;;  %s2406_s22 = smov (!%p2101_p12, %s2404_s22), 15  ;;  %p1634_p0 = scmp.ne.s32.totalorder %s1886_s27, 0 }
  0x21   : > { %v1804_v43 = vpack.i.bf16 %v678_v41, %v668_v37  ;;  %v671_v44 = vsel %vm585_vm1, %v663_v15, %v659_v20  ;;  %v2115_v45 = vsel %vm572_vm0, %v637_v9, %v641_v6  ;;  %v649_v47 = vsel %vm572_vm0, %v641_v6, %v637_v9  ;;  %v1831_v58 = vld [vmem:[%s488_s28] sm:%s1830_s24]  ;;  %v1834_v61 = vld [vmem:[%s488_s28 + $0x8] sm:%s1830_s24]  ;;  %s1571_s23 = sshll.u32 %s2406_s22, 1 }
  0x22   : > { %v676_v46 = vsel %vm582_vm2, %v671_v44, 0.0  ;;  %v2127_v48 = vsel %vm572_vm0, %v635_v19, %v639_v14  ;;  %v2137_v51 = vsel %vm568_vm3, %v649_v47, 0.0  ;;  %v647_v52 = vsel %vm572_vm0, %v639_v14, %v635_v19  ;;  %v1844_v6 = vld [vmem:[%s2374_s3] sm:$0x3f]   ;;  %s522_s28 = sadd.s32 %s1571_s23, %s2017_s16 }
  0x23   : > { %1795 = vrot.lane.b32.xlu0 %v1794_v39, %s1913_s20  ;;  %v1799_v50 = vpack.i.bf16 %v676_v46, %v667_v42  ;;  %v2143_v53 = vsel %vm572_vm0, %v638_v24, %v642_v21  ;;  %v2148_v54 = vsel %vm568_vm3, %v647_v52, 0.0  ;;  %v650_v55 = vsel %vm572_vm0, %v642_v21, %v638_v24  ;;  %1708 = vmatprep.subr.msk.bf16.mxu1 %vm914_vm4, %v1844_v6  ;;  %s1573_s22 = sshll.u32 %s522_s28, 3 }
  0x24   : > { %1790 = vrot.lane.b32.xlu1 %v1789_v40, %s1913_s20  ;;  %v2154_v56 = vsel %vm572_vm0, %v636_v29, %v640_v26  ;;  %v648_v57 = vsel %vm572_vm0, %v640_v26, %v636_v29  ;;  %v2164_v59 = vsel %vm568_vm3, %v650_v55, 0.0  ;;  %v570_v62 = vrot.slane %v1831_v58, 7  ;;  %s524_s18 = scalar_lea.vmem %s2373_s2, %s1573_s22 }
  0x25   : > { %v2168_v60 = vsel %vm568_vm3, %v648_v57, 0.0  ;;  %v583_v63 = vrot.slane %v1831_v58, 1  ;;  %v571_v3 = vrot.slane %v1834_v61, 7  ;;  %v584_v4 = vrot.slane %v1834_v61, 1  ;;  %s1836_s24 = scalar_select %p806_p13, 255, 0 }
  0x26   : > { %v1809_v5 = vpack.i.bf16 %v1834_v61, %v1831_v58  ;;  %v2198_v13 = vsel %vm914_vm4, %v1844_v6, 0  ;;  %v2202_v14 = vsel %vm914_vm4, %v1846_v7, 0 }
  0x27   : > { %1800 = vrot.lane.b32.xlu0 %v1799_v50, %s1913_s20  ;;  %v586_v8 = vsel %vm585_vm1, %v583_v63, %v584_v4  ;;  %v587_v9 = vsel %vm585_vm1, %v584_v4, %v583_v63  ;;  %v2189_v10 = vsel %vm572_vm0, %v570_v62, %v571_v3  ;;  %v574_v12 = vsel %vm572_vm0, %v571_v3, %v570_v62  ;;  %v1837_v17 = vld [vmem:[%s524_s18] sm:%s1836_s24] }
  0x28   : > { %1805 = vrot.lane.b32.xlu1 %v1804_v43, %s1913_s20  ;;  %v593_v11 = vsel %vm582_vm2, %v587_v9, 0.0  ;;  %v2207_v16 = vsel %vm568_vm3, %v574_v12, 0.0  ;;  %v1840_v18 = vld [vmem:[%s524_s18 + $0x8] sm:%s1836_s24]  ;;  %v812_v19 = vrot.slane %v1837_v17, 7  ;;  %v818_v20 = vrot.slane %v1837_v17, 1 }
  0x29   : > { %v1814_v15 = vpack.i.bf16 %v593_v11, %v586_v8  ;;  %v813_v21 = vrot.slane %v1840_v18, 7  ;;  %v819_v22 = vrot.slane %v1840_v18, 1  ;;  %v1819_v23 = vpack.i.bf16 %v1840_v18, %v1837_v17 }
  0x2b   : > { %1810 = vrot.lane.b32.xlu0 %v1809_v5, %s1912_s19  ;;  %v820_v24 = vsel %vm585_vm1, %v818_v20, %v819_v22  ;;  %v821_v25 = vsel %vm585_vm1, %v819_v22, %v818_v20  ;;  %v2222_v26 = vsel %vm572_vm0, %v812_v19, %v813_v21  ;;  %v815_v27 = vsel %vm572_vm0, %v813_v21, %v812_v19 }
  0x2c   : > { %1815 = vrot.lane.b32.xlu1 %v1814_v15, %s1913_s20  ;;  %v823_v28 = vsel %vm582_vm2, %v821_v25, 0.0  ;;  %v2230_v29 = vsel %vm568_vm3, %v815_v27, 0.0 }
  0x2d   : > { %v1824_v30 = vpack.i.bf16 %v823_v28, %v820_v24 }
  0x2f   : > { %1820 = vrot.lane.b32.xlu0 %v1819_v23, %s1912_s19 }
  0x30   : > { %1825 = vrot.lane.b32.xlu1 %v1824_v30, %s1913_s20  ;;  %s1578_s20 = sshll.u32 %s2028_s21, 2 }
  0x31   : > { %s2305_s26 = scalar_lea.vmem %s2378_s7, %s1578_s20 }
  0x8d   : > { %v1771_v31 = vpop.permute.xlu0 %1770 }
  0x8e   : > { %v1781_v32 = vpop.permute.xlu1 %1780  ;;  %v1773_v34 = vunpack.i.h.bf16 %v1771_v31  ;;  %v1772_v35 = vunpack.i.l.bf16 %v1771_v31 }
  0x8f   : > { %v1783_v39 = vunpack.i.h.bf16 %v1781_v32  ;;  %v1782_v40 = vunpack.i.l.bf16 %v1781_v32 }
  0x90   : > { %v751_v1 = vsel %vm610_vm5, %v2137_v51, %v1772_v35  ;;  %v752_v41 = vsel %vm610_vm5, %v2115_v45, %v1773_v34 }
  0x91   : > { %v1776_v33 = vpop.permute.xlu0 %1775  ;;  %v747_v5 = vsel %vm610_vm5, %v2148_v54, %v1782_v40  ;;  %v748_v6 = vsel %vm610_vm5, %v2127_v48, %v1783_v39 }
  0x92   : > { %v1786_v36 = vpop.permute.xlu1 %1785  ;;  %v1778_v37 = vunpack.i.h.bf16 %v1776_v33  ;;  %v1777_v38 = vunpack.i.l.bf16 %v1776_v33 }
  0x93   : > { %v1788_v52 = vunpack.i.h.bf16 %v1786_v36  ;;  %v1787_v55 = vunpack.i.l.bf16 %v1786_v36 }
  0x94   : > { %v754_v46 = vsel %vm610_vm5, %v2143_v53, %v1778_v37  ;;  %v753_v47 = vsel %vm610_vm5, %v2164_v59, %v1777_v38 }
  0x95   : > { %v1796_v2 = vpop.permute.xlu0 %1795  ;;  %v750_v9 = vsel %vm610_vm5, %v2154_v56, %v1788_v52  ;;  %v749_v11 = vsel %vm610_vm5, %v2168_v60, %v1787_v55 }
  0x96   : > { %v1798_v42 = vunpack.i.h.bf16 %v1796_v2  ;;  %v1797_v43 = vunpack.i.l.bf16 %v1796_v2  ;;  %v1791_v44 = vpop.permute.xlu1 %1790 }
  0x97   : > { %v1793_v49 = vunpack.i.h.bf16 %v1791_v44  ;;  %v1792_v50 = vunpack.i.l.bf16 %v1791_v44 }
  0x98   : > { %v761_v57 = vsel %vm613_vm6, %v753_v47, %v1797_v43  ;;  %v762_v51 = vsel %vm613_vm6, %v754_v46, %v1798_v42 }
  0x99   : > { %v1647_v58 = vpack.c.bf16 %v761_v57, %v761_v57  ;;  %v1648_v61 = vpack.c.bf16 %v762_v51, %v762_v51  ;;  %v760_v45 = vsel %vm613_vm6, %v752_v41, %v1793_v49  ;;  %v759_v62 = vsel %vm613_vm6, %v751_v1, %v1792_v50  ;;  %v1801_v63 = vpop.permute.xlu0 %1800 }
  0x9a   : > { %v1646_v0 = vpack.c.bf16 %v760_v45, %v760_v45  ;;  %v1645_v53 = vpack.c.bf16 %v759_v62, %v759_v62  ;;  %v1806_v3 = vpop.permute.xlu1 %1805  ;;  %v1803_v4 = vunpack.i.h.bf16 %v1801_v63  ;;  %v1802_v59 = vunpack.i.l.bf16 %v1801_v63 }
  0x9b   : > { %802 = vst.msk [vmem:[#allocation2 + $0x20] sm:$0xf] %vm624_vm7, %v1647_v58  ;;  %803 = vst.msk [vmem:[#allocation2 + $0x24] sm:$0xf] %vm624_vm7, %v1648_v61  ;;  %v1808_v7 = vunpack.i.h.bf16 %v1806_v3  ;;  %v1807_v8 = vunpack.i.l.bf16 %v1806_v3 }
  0x9c   : > { %801 = vst.msk [vmem:[#allocation2 + $0x1c] sm:$0xf] %vm624_vm7, %v1646_v0  ;;  %800 = vst.msk [vmem:[#allocation2 + $0x18] sm:$0xf] %vm624_vm7, %v1645_v53  ;;  %v755_v54 = vsel %vm613_vm6, %v747_v5, %v1802_v59  ;;  %v756_v48 = vsel %vm613_vm6, %v748_v6, %v1803_v4  ;;  %v2298_v4 = vld [vmem:[%s2375_s4] ss:$0 sm:$0xff] }
  0x9d   : > { %v757_v12 = vsel %vm613_vm6, %v749_v11, %v1807_v8  ;;  %v758_v15 = vsel %vm613_vm6, %v750_v9, %v1808_v7  ;;  %v1641_v17 = vpack.c.bf16 %v755_v54, %v755_v54  ;;  %v1642_v18 = vpack.c.bf16 %v756_v48, %v756_v48  ;;  %v1811_v19 = vpop.permute.xlu0 %1810 }
  0x9e   : > { %v1643_v20 = vpack.c.bf16 %v757_v12, %v757_v12  ;;  %v1644_v56 = vpack.c.bf16 %v758_v15, %v758_v15  ;;  %v1813_v21 = vunpack.i.h.bf16 %v1811_v19  ;;  %v1812_v22 = vunpack.i.l.bf16 %v1811_v19  ;;  %v1816_v60 = vpop.permute.xlu1 %1815 }
  0x9f   : > { %796 = vst.msk [vmem:[#allocation2 + $0x8] sm:$0xf] %vm624_vm7, %v1641_v17  ;;  %797 = vst.msk [vmem:[#allocation2 + $0xc] sm:$0xf] %vm624_vm7, %v1642_v18  ;;  %v1818_v25 = vunpack.i.h.bf16 %v1816_v60  ;;  %v1817_v27 = vunpack.i.l.bf16 %v1816_v60 }
  0xa0   : > { %798 = vst.msk [vmem:[#allocation2 + $0x10] sm:$0xf] %vm624_vm7, %v1643_v20  ;;  %799 = vst.msk [vmem:[#allocation2 + $0x14] sm:$0xf] %vm624_vm7, %v1644_v56  ;;  %v611_v23 = vsel %vm610_vm5, %v2207_v16, %v1812_v22  ;;  %v612_v24 = vsel %vm610_vm5, %v2189_v10, %v1813_v21 }
  0xa1   : > { %v614_v28 = vsel %vm613_vm6, %v611_v23, %v1817_v27  ;;  %v615_v30 = vsel %vm613_vm6, %v612_v24, %v1818_v25  ;;  %v1821_v16 = vpop.permute.xlu0 %1820 }
  0xa2   : > { %v1843_v31 = vld [vmem:[#allocation2 + $0x20] sm:$0xff]   ;;  %v1639_v32 = vpack.c.bf16 %v614_v28, %v614_v28  ;;  %v1640_v33 = vpack.c.bf16 %v615_v30, %v615_v30  ;;  %v1823_v35 = vunpack.i.h.bf16 %v1821_v16  ;;  %v1822_v36 = vunpack.i.l.bf16 %v1821_v16  ;;  %v1826_v2 = vpop.permute.xlu1 %1825 }
  0xa3   : > { %v1842_v34 = vld [vmem:[#allocation2 + $0x18] sm:$0xff]   ;;  %v1828_v1 = vunpack.i.h.bf16 %v1826_v2  ;;  %v1827_v41 = vunpack.i.l.bf16 %v1826_v2  ;;  %v1853_v47 = vld [vmem:[#allocation2 + $0x20] sm:$0xff]  }
  0xa4   : > { %625 = vst.msk [vmem:[#allocation2] sm:$0xf] %vm624_vm7, %v1639_v32  ;;  %626 = vst.msk [vmem:[#allocation2 + $0x4] sm:$0xf] %vm624_vm7, %v1640_v33  ;;  %1680 = vmatprep.mubr.msk.bf16.mxu1 %vm901_vm8, %v1842_v34  ;;  %v841_v39 = vsel %vm610_vm5, %v2222_v26, %v1823_v35  ;;  %v840_v40 = vsel %vm610_vm5, %v2230_v29, %v1822_v36  ;;  %v1854_v49 = vld [vmem:[#allocation2 + $0x18] sm:$0xff]  }
  0xa5   : > { %1681 = vmatmul.mubr.msk.bf16.vlgmr.msra.gmra.mxu1 %vm901_vm8, %v1843_v31  ;;  %v842_v42 = vsel %vm613_vm6, %v840_v40, %v1827_v41 }
  0xa6   : > { %v1845_v10 = vld [vmem:[#allocation2 + $0x8] sm:$0xff]   ;;  %1685 = vmatpush3.bf16.msra.mxu1 %v2198_v13  ;;  %v843_v13 = vsel %vm613_vm6, %v841_v39, %v1828_v1  ;;  %v1649_v46 = vpack.c.bf16 %v842_v42, %v842_v42 }
  0xa7   : > { %v1847_v37 = vld [vmem:[#allocation2 + $0x10] sm:$0xff]   ;;  %1676 = vmatprep.mubr.msk.bf16.mxu0 %vm901_vm8, %v1845_v10  ;;  %v1650_v44 = vpack.c.bf16 %v843_v13, %v843_v13  ;;  %v1850_v26 = vld [vmem:[#allocation2 + $0x8] sm:$0xff]  }
  0xa8   : > { %v1848_v38 = vld [vmem:[#allocation2 + $0x10] sm:$0xff]   ;;  %1677 = vmatmul.mubr.msk.bf16.vlgmr.msra.gmra.mxu0 %vm901_vm8, %v1847_v37  ;;  %853 = vst.msk [vmem:[#allocation2 + $0x28] sm:$0xf] %vm624_vm7, %v1649_v46 }
  0xa9   : > { %1695 = vmatpush3.bf16.msra.mxu0 %v2202_v14  ;;  %1696 = vmatprep.mubr.msk.bf16.mxu0 %vm901_vm8, %v1848_v38  ;;  %v1851_v29 = vld [vmem:[#allocation2 + $0x10] sm:$0xff]   ;;  %854 = vst.msk [vmem:[#allocation2 + $0x2c] sm:$0xf] %vm624_vm7, %v1650_v44  ;;  %v1852_v14 = vld [vmem:[#allocation2 + $0x18] sm:$0xff]  }
  0xab   : > { %v1849_v43 = vld [vmem:[#allocation2] sm:$0xff]  }
  0xac   : > { %1686 = vmatprep.mubr.msk.bf16.mxu1 %vm901_vm8, %v1849_v43 }
  0xad   : > { %1687 = vmatmul.mubr.msk.bf16.vlgmr.msra.gmra.mxu1 %vm901_vm8, %v1850_v26 }
  0xae   : > { %1690 = vmatprep.mubr.msk.bf16.mxu1 %vm901_vm8, %v1851_v29 }
  0xb0   : > { %1697 = vmatmul.mubr.msk.bf16.vlgmr.msra.gmra.mxu0 %vm901_vm8, %v1852_v14  ;;  %v1855_v50 = vld [vmem:[#allocation2 + $0x28] sm:$0xff]  }
  0xb1   : > { %1700 = vmatprep.mubr.msk.bf16.mxu0 %vm901_vm8, %v1853_v47 }
  0xb5   : > { %1691 = vmatmul.mubr.msk.bf16.gmra.mxu1 %vm901_vm8, %v1854_v49 }
  0xb8   : > { %1701 = vmatmul.mubr.msk.bf16.gmra.mxu0 %vm901_vm8, %v1855_v50 }
 0x165   : > { %v1682_v52 = vpop.f32.mrf.mxu1 }
 0x167   : > { %v968_v55 = vpop.f32.mrf.mxu1 }
 0x168   : > { %v1678_v57 = vpop.f32.mrf.mxu0 }
 0x169   : > { %v1683_v51 = vpop.f32.mrf.mxu1 }
 0x16a   : > { %v952_v58 = vpop.f32.mrf.mxu0 }
 0x16b   : > { %v971_v61 = vpop.f32.mrf.mxu1 }
 0x16c   : > { %v1679_v45 = vpop.f32.mrf.mxu0 }
 0x16d   : > { %v1688_v62 = vpop.f32.mrf.mxu1 }
 0x16e   : > { %v955_v63 = vpop.f32.mrf.mxu0  ;;  %v1066_v0 = vadd.f32 %v1688_v62, %v1678_v57 }
 0x16f   : > { %v1057_v53 = vpop.f32.mrf.mxu1 }
 0x170   : > { %v1698_v3 = vpop.f32.mrf.mxu0  ;;  %v1058_v59 = vadd.f32 %v1057_v53, %v952_v58 }
 0x171   : > { %v1207_v5 = vadd.f32 %v1698_v3, %v1066_v0  ;;  %v1689_v6 = vpop.f32.mrf.mxu1 }
 0x172   : > { %v1174_v7 = vpop.f32.mrf.mxu0  ;;  %v1069_v9 = vadd.f32 %v1689_v6, %v1679_v45 }
 0x173   : > { %v1222_v8 = vadd.f32 %v2298_v4, %v1207_v5  ;;  %v1205_v11 = vadd.f32 %v1174_v7, %v1058_v59  ;;  %v1060_v54 = vpop.f32.mrf.mxu1 }
 0x174   : > { %v1699_v48 = vpop.f32.mrf.mxu0  ;;  %v1061_v17 = vadd.f32 %v1060_v54, %v955_v63 }
 0x175   : > { %v1653_v12 = vpack.c.bf16 %v1222_v8, %v1222_v8  ;;  %v1220_v15 = vadd.f32 %v2298_v4, %v1205_v11  ;;  %v1208_v18 = vadd.f32 %v1699_v48, %v1069_v9  ;;  %v1692_v19 = vpop.f32.mrf.mxu1  ;;  %v1272_v27 = vsel %vm613_vm6, %v1222_v8, 0.0 }
 0x176   : > { %v1177_v20 = vpop.f32.mrf.mxu0  ;;  %v1082_v22 = vadd.f32 %v1692_v19, %v1682_v52  ;;  %v1292_v34 = vmul.f32 %v1222_v8, %v1222_v8 }
 0x177   : > { %1263 = vst.msk [vmem:[%s2305_s26 + $0x8] sm:$0xf] %vm1260_vm9, %v1653_v12  ;;  %v1651_v56 = vpack.c.bf16 %v1220_v15, %v1220_v15  ;;  %v1223_v21 = vadd.f32 %v2298_v4, %v1208_v18  ;;  %v1206_v60 = vadd.f32 %v1177_v20, %v1061_v17  ;;  %v1073_v23 = vpop.f32.mrf.mxu1  ;;  %v1290_v28 = vmul.f32 %v1220_v15, %v1220_v15 }
 0x178   : > { %v1702_v24 = vpop.f32.mrf.mxu0  ;;  %v1074_v25 = vadd.f32 %v1073_v23, %v968_v55  ;;  %v1269_v36 = vsel %vm613_vm6, %v1220_v15, 0.0  ;;  %v1301_v50 = vsel %vm613_vm6, %v1292_v34, 0.0 }
 0x179   : > { %1261 = vst.msk [vmem:[%s2305_s26] sm:$0xf] %vm1260_vm9, %v1651_v56  ;;  %v1654_v30 = vpack.c.bf16 %v1223_v21, %v1223_v21  ;;  %v1221_v31 = vadd.f32 %v2298_v4, %v1206_v60  ;;  %v1693_v32 = vpop.f32.mrf.mxu1  ;;  %v1211_v16 = vadd.f32 %v1702_v24, %v1082_v22  ;;  %v1298_v43 = vsel %vm613_vm6, %v1290_v28, 0.0 }
 0x17a   : > { %v1190_v33 = vpop.f32.mrf.mxu0  ;;  %v1085_v10 = vadd.f32 %v1693_v32, %v1683_v51  ;;  %v1293_v44 = vmul.f32 %v1223_v21, %v1223_v21  ;;  %v1274_v52 = vsel %vm613_vm6, %v1223_v21, 0.0 }
 0x17b   : > { %v1209_v35 = vadd.f32 %v1190_v33, %v1074_v25  ;;  %1264 = vst.msk [vmem:[%s2305_s26 + $0xc] sm:$0xf] %vm1260_vm9, %v1654_v30  ;;  %v1652_v37 = vpack.c.bf16 %v1221_v31, %v1221_v31  ;;  %v1270_v38 = vsel %vm613_vm6, %v1221_v31, 0.0  ;;  %v1291_v39 = vmul.f32 %v1221_v31, %v1221_v31  ;;  %v1076_v40 = vpop.f32.mrf.mxu1 }
 0x17c   : > { %v1703_v2 = vpop.f32.mrf.mxu0  ;;  %v1271_v1 = vadd.f32 %v1270_v38, %v1269_v36  ;;  %v1226_v41 = vadd.f32 %v2298_v4, %v1211_v16  ;;  %v1077_v42 = vadd.f32 %v1076_v40, %v971_v61  ;;  %v1303_v62 = vsel %vm613_vm6, %v1293_v44, 0.0 }
 0x17d   : > { %v1224_v13 = vadd.f32 %v2298_v4, %v1209_v35  ;;  %1262 = vst.msk [vmem:[%s2305_s26 + $0x4] sm:$0xf] %vm1260_vm9, %v1652_v37  ;;  %v1299_v46 = vsel %vm613_vm6, %v1291_v39, 0.0  ;;  %v1212_v26 = vadd.f32 %v1703_v2, %v1085_v10 }
 0x17e   : > { %v1193_v29 = vpop.f32.mrf.mxu0  ;;  %v1273_v14 = vadd.f32 %v1272_v27, %v1271_v1  ;;  %v1300_v47 = vadd.f32 %v1299_v46, %v1298_v43  ;;  %v1657_v49 = vpack.c.bf16 %v1226_v41, %v1226_v41  ;;  %v1296_v7 = vmul.f32 %v1226_v41, %v1226_v41 }
 0x17f   : > { %v1655_v55 = vpack.c.bf16 %v1224_v13, %v1224_v13  ;;  %v1294_v57 = vmul.f32 %v1224_v13, %v1224_v13  ;;  %v1227_v61 = vadd.f32 %v2298_v4, %v1212_v26  ;;  %v1210_v45 = vadd.f32 %v1193_v29, %v1077_v42 }
 0x180   : > { %v1302_v51 = vadd.f32 %v1301_v50, %v1300_v47  ;;  %1267 = vst.msk [vmem:[%s2305_s26 + $0x18] sm:$0xf] %vm1260_vm9, %v1657_v49  ;;  %v1275_v58 = vadd.f32 %v1274_v52, %v1273_v14  ;;  %v1276_v63 = vsel %vm613_vm6, %v1224_v13, 0.0  ;;  %v1280_v48 = vsel %vm613_vm6, %v1226_v41, 0.0 }
 0x181   : > { %1265 = vst.msk [vmem:[%s2305_s26 + $0x10] sm:$0xf] %vm1260_vm9, %v1655_v55  ;;  %v1658_v3 = vpack.c.bf16 %v1227_v61, %v1227_v61  ;;  %v1305_v59 = vsel %vm613_vm6, %v1294_v57, 0.0  ;;  %v1225_v5 = vadd.f32 %v2298_v4, %v1210_v45  ;;  %v1297_v12 = vmul.f32 %v1227_v61, %v1227_v61 }
 0x182   : > { %v1277_v0 = vadd.f32 %v1276_v63, %v1275_v58  ;;  %v1304_v53 = vadd.f32 %v1303_v62, %v1302_v51  ;;  %v1309_v4 = vsel %vm613_vm6, %v1296_v7, 0.0  ;;  %v1282_v19 = vsel %vm613_vm6, %v1227_v61, 0.0 }
 0x183   : > { %1268 = vst.msk [vmem:[%s2305_s26 + $0x1c] sm:$0xf] %vm1260_vm9, %v1658_v3  ;;  %v1656_v8 = vpack.c.bf16 %v1225_v5, %v1225_v5  ;;  %v1278_v9 = vsel %vm613_vm6, %v1225_v5, 0.0  ;;  %v1295_v11 = vmul.f32 %v1225_v5, %v1225_v5  ;;  %v1311_v21 = vsel %vm613_vm6, %v1297_v12, 0.0 }
 0x184   : > { %v1306_v6 = vadd.f32 %v1305_v59, %v1304_v53  ;;  %v1279_v54 = vadd.f32 %v1278_v9, %v1277_v0 }
 0x185   : > { %1266 = vst.msk [vmem:[%s2305_s26 + $0x14] sm:$0xf] %vm1260_vm9, %v1656_v8  ;;  %v1307_v15 = vsel %vm613_vm6, %v1295_v11, 0.0 }
 0x186   : > { %v1281_v17 = vadd.f32 %v1280_v48, %v1279_v54  ;;  %v1308_v18 = vadd.f32 %v1307_v15, %v1306_v6 }
 0x188   : > { %v1283_v20 = vadd.f32 %v1282_v19, %v1281_v17  ;;  %v1310_v56 = vadd.f32 %v1309_v4, %v1308_v18 }
 0x18a   : > { %v1284_v22 = vrot.slane %v1283_v20, 4  ;;  %v1312_v60 = vadd.f32 %v1311_v21, %v1310_v56 }
 0x18c   : > { %v1285_v23 = vadd.f32 %v1284_v22, %v1283_v20  ;;  %v1313_v24 = vrot.slane %v1312_v60, 4 }
 0x18e   : > { %v1286_v25 = vrot.slane %v1285_v23, 2  ;;  %v1314_v27 = vadd.f32 %v1313_v24, %v1312_v60 }
 0x190   : > { %v1287_v28 = vadd.f32 %v1286_v25, %v1285_v23  ;;  %v1315_v30 = vrot.slane %v1314_v27, 2 }
 0x192   : > { %v1288_v31 = vrot.slane %v1287_v28, 1  ;;  %v1316_v32 = vadd.f32 %v1315_v30, %v1314_v27 }
 0x194   : > { %v1317_v33 = vrot.slane %v1316_v32, 1  ;;  %v1289_v34 = vadd.f32 %v1288_v31, %v1287_v28  ;;  %1324 = sbr.rel (%p1634_p0) target bundleno = 411 (0x19b), region = 52 }
 0x196   : > { %v1318_v16 = vadd.f32 %v1317_v33, %v1316_v32 }
 0x198   : > { %v1320_v10 = vsel %vm1319_vm10, %v1289_v34, %v1318_v16 }
 0x199   : > { %vm1325_vm11 = vcmask 58368   ;;  %v1914_v35 = vmov 0.0  }
 0x19a   : > { %1326 = vst.msk [vmem:[%s2048_s17] sm:$0x3] %vm1325_vm11, %v1914_v35 }
 0x19b PF: > { %vm1329_vm12 = vcmask 58368  }
 0x1a1   : > { %v1327_v36 = vld [vmem:[%s2048_s17] sm:$0x3] }
 0x1a2   : > { %v1328_v37 = vadd.f32 %v1327_v36, %v1320_v10 }
 0x1a4   : > { %1330 = vst.msk [vmem:[%s2048_s17] sm:$0x3] %vm1329_vm12, %v1328_v37 }
 0x1a5 PF: > { %s19_s10 = sadd.s32 1, %s1910_s10   ;;  %s2381_s27 = smov %s1898_s30 }
 0x1a6   : > { %p16_p1 = scmp.ge.s32.totalorder %s19_s10, 10   ;;  %s2382_s28 = smov %s1902_s9 }
 0x1a7   : > { %s2383_s29 = smov %s1906_s5  ;;  %s2384_s30 = smov %s2388_s6 }
 0x1a8   : > { %s2385_s9 = smov %s2392_s11  ;;  %s2386_s5 = smov %s2396_s12 }
 0x1a9   :  { %18 = sbr.rel (!%p16_p1) target bundleno = 4 (0x4), region = 105 }

// kernel: conv3x3_forward.4
= control target key start
LH: loop header
LB: loop body
LE: loop exit
PB: predicated region body
PF: predicated region fallthrough
CT: control target
= control target key end

     0   :  { %s2105_s27 = smov 0   ;;  %s2107_s28 = smov 0   ;;  %s2594_s0 = inlined_call_operand.vmem [shape: bf16[2,16,16,8], index: 0, kind: input, shape index: {}, may-alias: {0,1,2}]   ;;  %s2595_s1 = inlined_call_operand.vmem [shape: bf16[2,16,16,8], index: 1, kind: input, shape index: {}, may-alias: {0,1,2}]   ;;  %s2596_s2 = inlined_call_operand.vmem [shape: bf16[2,16,16,8], index: 2, kind: input, shape index: {}, may-alias: {0,1,2}]   ;;  %s2597_s3 = inlined_call_operand.vmem [shape: bf16[3,24,8], index: 3, kind: input, shape index: {}]   ;;  %s2598_s4 = inlined_call_operand.vmem [shape: f32[1,8], index: 4, kind: input, shape index: {}]   ;;  %s2599_s5 = inlined_call_operand.vmem [shape: f32[1,8], index: 5, kind: input, shape index: {}]   ;;  %s2600_s6 = inlined_call_operand.vmem [shape: f32[1,8], index: 6, kind: input, shape index: {}]   ;;  %s2601_s7 = inlined_call_operand.vmem [shape: bf16[2,16,16,8], index: 7, kind: output, shape index: {0}]   ;;  %s2602_s8 = inlined_call_operand.vmem [shape: f32[2,2,2,8], index: 8, kind: output, shape index: {1}]  }
   0x1   :  { %s2109_s29 = smov 0   ;;  %s2111_s30 = smov 0  }
   0x2   :  { %s2113_s9 = smov 0   ;;  %s2115_s10 = smov 0  }
   0x3   :  { %s2117_s11 = smov 0  }
   0x4 LB: > { %2604 = sst [smem:[#allocation3_spill]] %s2051_s10  ;;  %s31_s12 = sadd.s32 1, %s2043_s30  ;;  %s2055_s11 = sphi %s2117_s11, %s19_s11   ;;  %s2051_s10 = sphi %s2115_s10, %s2614_s10   ;;  %s2047_s9 = sphi %s2113_s9, %s2618_s9   ;;  %s2043_s30 = sphi %s2111_s30, %s2617_s30   ;;  %s2039_s29 = sphi %s2109_s29, %s2611_s29   ;;  %s2035_s28 = sphi %s2107_s28, %s2616_s28   ;;  %s2031_s27 = sphi %s2105_s27, %s2615_s27  }
   0x5   : > { %p32_p0 = scmp.ge.s32.totalorder %s31_s12, 2  ;;  %s34_s13 = sadd.s32 1, %s2047_s9 }
   0x6   : > { %p1654_p1 = scmp.ge.s32.totalorder %s2055_s11, 1  ;;  %p388_p2 = scmp.lt.s32.totalorder %s2055_s11, 9 }
   0x7   : > { %s2620_s12 = smov (%p32_p0, %s31_s12), 0  ;;  %s2622_s13 = smov (!%p32_p0, %s34_s13), %s2047_s9 }
   0x8   : > { %2605 = sst [smem:[#allocation4_spill]] %s2620_s12  ;;  %p389_p3 = pnand %p1654_p1, %p388_p2 }
   0x9   : > { %p36_p4 = scmp.ge.s32.totalorder %s2622_s13, 2  ;;  %s38_s14 = sadd.s32 1, %s2051_s10 }
   0xa   : > { %s1655_s15 = sshll.u32 (!%p389_p3), %s2035_s28, 1  ;;  %p480_p6 = scmp.lt.s32.totalorder (!%p389_p3), %s2039_s29, 1 }
   0xb   : > { %s2624_s13 = smov (%p36_p4, %s2622_s13), 0  ;;  %s2626_s14 = smov (!%p36_p4, %s38_s14), %s2051_s10 }
   0xc   : > { %2606 = sst [smem:[#allocation5_spill]] %s2624_s13  ;;  %p40_p5 = scmp.ge.s32.totalorder %s2626_s14, 2 }
   0xd   : > { %392 = sbr.rel (%p389_p3) target bundleno = 434 (0x1b2), region = 48  ;;  %s2153_s16 = sadd.s32 (!%p389_p3), %s2031_s27, %s1655_s15 }
   0xe   : > { %s2628_s14 = smov (%p40_p5, %s2626_s14), 0  ;;  %s2156_s17 = sshll.u32 (!%p389_p3), %s2153_s16, 2 }
   0xf   : > { %2607 = sst [smem:[#allocation6_spill]] %s2628_s14  ;;  %p548_p7 = scmp.lt.s32.totalorder (!%p389_p3), %s2035_s28, 1 }
  0x10   : > { %p500_p8 = scmp.lt.s32.totalorder (!%p389_p3), %s2156_s17, 15  ;;  %s2167_s22 = sadd.s32 (!%p389_p3), 4294967295, %s2156_s17 }
  0x11   : > { %p478_p9 = scmp.gt.s32.totalorder (!%p389_p3), %s2167_s22, 0  ;;  %p1658_p10 = scmp.lt.s32.totalorder (!%p389_p3), %s2167_s22, 15 }
  0x12   : > { %s2630_s29 = smov (!%p480_p6, %s2039_s29), 1  ;;  %v557_v0 = vlaneseq  ;;  %s2632_s28 = smov (!%p548_p7, %s2035_s28), 1  ;;  %v2181_v2 = vld [vmem:[%s2599_s5] ss:$0 sm:$0xff]  ;;  %vm1010_vm6 = vcmask 1043456   ;;  %vm632_vm7 = vcmask 64512  }
  0x13   : > { %s2160_s18 = sshll.u32 %s2630_s29, 5  ;;  %s1684_s19 = sshll.u32 %s2630_s29, 1  ;;  %v2196_v12 = vld [vmem:[%s2600_s6] ss:$0 sm:$0xff]  ;;  %vm635_vm8 = vcmask 130048   ;;  %vm646_vm9 = vcmask 191488  }
  0x14   : > { %s501_s20 = scalar_select %p500_p8, %s2156_s17, 15  ;;  %v2164_v1 = vshrl.u32 %v557_v0, 7  ;;  %vm997_vm10 = vcmask 195584   ;;  %vm1365_vm11 = vcmask 60416   ;;  %vm1424_vm12 = vcmask 1040384  }
  0x15   : > { %s551_s24 = sadd.s32 %s1684_s19, %s2632_s28  ;;  %s513_s12 = sadd.s32 4, %s2156_s17 }
  0x16   : > { %s1668_s21 = sshll.u32 %s501_s20, 1  ;;  %s1685_s26 = sshll.u32 %s551_s24, 1  ;;  %v2189_v6 = vadd.s32 8, %v2164_v1  ;;  %vm607_vm0 = vcmp.lt.s32.totalorder %v2164_v1, 7  ;;  %vm594_vm1 = vcmp.lt.s32.totalorder %v2164_v1, 1  ;;  %vm590_vm3 = vcmp.ge.s32.totalorder %v2164_v1, 1 }
  0x17   : > { %s2170_s23 = sadd.s32 %s1668_s21, %s2160_s18  ;;  %s2186_s21 = scalar_lea.vmem %s2602_s8, %s1685_s26 }
  0x18   : > { %s1670_s25 = sshll.u32 %s2170_s23, 2  ;;  %p2222_p11 = scmp.lt.s32.totalorder %s513_s12, 15  ;;  %vm604_vm2 = vcmp.lt.s32.totalorder %v2189_v6, 15 }
  0x19   : > { %s506_s29 = scalar_lea.vmem %s2595_s1, %s1670_s25  ;;  %p562_p12 = scmp.gt.s32.totalorder %s2153_s16, 0 }
  0x1a   : > { %v1800_v3 = vld [vmem:[%s506_s29 + $0x10] sm:$0xff]   ;;  %v1780_v4 = vld [vmem:[%s506_s29] sm:$0xff]   ;;  %v1801_v5 = vld [vmem:[%s506_s29 + $0x18] sm:$0xff]   ;;  %s479_s10 = scalar_select %p478_p9, %s2167_s22, 0 }
  0x1b   : > { %v1789_v7 = vunpack.c.l.bf16 %v1800_v3  ;;  %v1790_v8 = vunpack.c.h.bf16 %v1800_v3  ;;  %v1781_v9 = vunpack.c.l.bf16 %v1780_v4  ;;  %v1782_v10 = vunpack.c.h.bf16 %v1780_v4  ;;  %v1799_v11 = vld [vmem:[%s506_s29 + $0x8] sm:$0xff]   ;;  %p874_p13 = scmp.lt.s32.totalorder %s2153_s16, 3  ;;  %s2636_s12 = smov (!%p2222_p11, %s513_s12), 15 }
  0x1c   : > { %v1793_v13 = vunpack.c.l.bf16 %v1801_v5  ;;  %v1794_v14 = vunpack.c.h.bf16 %v1801_v5  ;;  %v1785_v15 = vunpack.c.l.bf16 %v1799_v11  ;;  %v1786_v16 = vunpack.c.h.bf16 %v1799_v11  ;;  %s2634_s10 = smov (!%p1658_p10, %s479_s10), 15  ;;  %s2057_s20 = smov 8  }
  0x1d   : > { %v676_v17 = vmul.f32 %v1789_v7, %v2181_v2  ;;  %v677_v18 = vmul.f32 %v1790_v8, %v2181_v2  ;;  %v672_v19 = vmul.f32 %v1781_v9, %v2181_v2  ;;  %v673_v20 = vmul.f32 %v1782_v10, %v2181_v2  ;;  %s1663_s14 = sshll.u32 %s2634_s10, 1  ;;  %s2638_s12 = smov (!%p2222_p11, %s2636_s12), 15 }
  0x1e   : > { %v678_v21 = vmul.f32 %v1793_v13, %v2181_v2  ;;  %v679_v22 = vmul.f32 %v1794_v14, %v2181_v2  ;;  %v674_v23 = vmul.f32 %v1785_v15, %v2181_v2  ;;  %v675_v24 = vmul.f32 %v1786_v16, %v2181_v2  ;;  %s486_s22 = sadd.s32 %s2160_s18, %s1663_s14  ;;  %s1676_s13 = sshll.u32 %s2638_s12, 1 }
  0x1f   : > { %v691_v25 = vadd.f32 %v2196_v12, %v676_v17  ;;  %v692_v26 = vadd.f32 %v2196_v12, %v677_v18  ;;  %v687_v27 = vadd.f32 %v2196_v12, %v672_v19  ;;  %v688_v28 = vadd.f32 %v2196_v12, %v673_v20  ;;  %s1665_s24 = sshll.u32 %s486_s22, 2  ;;  %s522_s16 = sadd.s32 %s1676_s13, %s2160_s18 }
  0x20   : > { %v693_v29 = vadd.f32 %v2196_v12, %v678_v21  ;;  %v694_v30 = vadd.f32 %v2196_v12, %v679_v22  ;;  %v689_v31 = vadd.f32 %v2196_v12, %v674_v23  ;;  %v690_v32 = vadd.f32 %v2196_v12, %v675_v24  ;;  %s488_s29 = scalar_lea.vmem %s2594_s0, %s1665_s24  ;;  %s1678_s10 = sshll.u32 %s522_s16, 2 }
  0x21   : > { %v2226_v33 = vmax.f32 %v691_v25, 0.0  ;;  %v2228_v34 = vmax.f32 %v692_v26, 0.0  ;;  %v2230_v35 = vmax.f32 %v687_v27, 0.0  ;;  %v2232_v36 = vmax.f32 %v688_v28, 0.0  ;;  %s2272_s28 = scalar_select %p562_p12, 1, 0 }
  0x22   : > { %v2236_v37 = vmax.f32 %v693_v29, 0.0  ;;  %v2238_v38 = vmax.f32 %v694_v30, 0.0  ;;  %v2240_v39 = vmax.f32 %v689_v31, 0.0  ;;  %v2242_v40 = vmax.f32 %v690_v32, 0.0  ;;  %v1776_v60 = vld [vmem:[%s488_s29] sm:$0xff]   ;;  %s524_s19 = scalar_lea.vmem %s2596_s2, %s1678_s10  ;;  %s2058_s18 = smov 16  }
  0x23   : > { %v709_v41 = vrot.slane %v2228_v34, 7  ;;  %v1923_v42 = vpack.i.bf16 %v2228_v34, %v2226_v33  ;;  %v705_v43 = vrot.slane %v2226_v33, 7  ;;  %v707_v44 = vrot.slane %v2232_v36, 7  ;;  %s2291_s17 = scalar_select %p874_p13, 1, 0  ;;  %v1796_v20 = vld [vmem:[%s524_s19] sm:$0xff]  }
  0x24   : > { %v1933_v45 = vpack.i.bf16 %v2232_v36, %v2230_v35  ;;  %v1928_v46 = vpack.i.bf16 %v2238_v38, %v2236_v37  ;;  %v1938_v47 = vpack.i.bf16 %v2242_v40, %v2240_v39  ;;  %v730_v48 = vrot.slane %v2236_v37, 1  ;;  %s2528_s24 = scalar_lea.vmem %s2601_s7, %s1670_s25  ;;  %p1750_p0 = scmp.ne.s32.totalorder %s2031_s27, 0 }
  0x25   : > { %1924 = vrot.lane.b32.xlu0 %v1923_v42, %s2057_s20  ;;  %v734_v49 = vrot.slane %v2238_v38, 1  ;;  %v729_v50 = vrot.slane %v2226_v33, 1  ;;  %v733_v51 = vrot.slane %v2228_v34, 1  ;;  %v728_v52 = vrot.slane %v2240_v39, 1 }
  0x26   : > { %1934 = vrot.lane.b32.xlu1 %v1933_v45, %s2057_s20  ;;  %v732_v53 = vrot.slane %v2242_v40, 1  ;;  %v727_v54 = vrot.slane %v2230_v35, 1  ;;  %v731_v55 = vrot.slane %v2232_v36, 1  ;;  %v703_v3 = vrot.slane %v2230_v35, 7 }
  0x27   : > { %v738_v56 = vsel %vm607_vm0, %v730_v48, %v734_v49  ;;  %v742_v57 = vsel %vm607_vm0, %v734_v49, %v730_v48  ;;  %v737_v58 = vsel %vm607_vm0, %v729_v50, %v733_v51  ;;  %v741_v59 = vsel %vm607_vm0, %v733_v51, %v729_v50 }
  0x28   : > { %v750_v61 = vsel %vm604_vm2, %v742_v57, 0.0  ;;  %v748_v62 = vsel %vm604_vm2, %v741_v59, 0.0  ;;  %v736_v63 = vsel %vm607_vm0, %v728_v52, %v732_v53  ;;  %v740_v0 = vsel %vm607_vm0, %v732_v53, %v728_v52 }
  0x29   : > { %1929 = vrot.lane.b32.xlu0 %v1928_v46, %s2057_s20  ;;  %v1948_v4 = vpack.i.bf16 %v750_v61, %v738_v56  ;;  %v746_v5 = vsel %vm604_vm2, %v740_v0, 0.0  ;;  %v735_v7 = vsel %vm607_vm0, %v727_v54, %v731_v55  ;;  %v1943_v8 = vpack.i.bf16 %v748_v62, %v737_v58  ;;  %v1983_v58 = vld [vmem:[%s2597_s3 + $0x14] ss:$0 sps:$4 sm:$0xff]  }
  0x2a   : > { %1939 = vrot.lane.b32.xlu1 %v1938_v47, %s2057_s20  ;;  %v739_v9 = vsel %vm607_vm0, %v731_v55, %v727_v54  ;;  %v1777_v10 = vunpack.c.l.bf16 %v1776_v60  ;;  %v1778_v11 = vunpack.c.h.bf16 %v1776_v60  ;;  %v1958_v13 = vpack.i.bf16 %v746_v5, %v736_v63  ;;  %v1987_v63 = vld [vmem:[%s2597_s3 + $0x8] ss:$0 sps:$4 sm:$0xff]   ;;  %1861 = vmatprep.subr.msk.bf16.mxu1 %vm1010_vm6, %v1983_v58 }
  0x2b   : > { %v744_v14 = vsel %vm604_vm2, %v739_v9, 0.0  ;;  %v586_v15 = vstv %s2272_s28  ;;  %v2321_v16 = vsel %vm594_vm1, %v705_v43, %v709_v41  ;;  %v898_v21 = vstv %s2291_s17  ;;  %1860 = vmatprep.subr.msk.bf16.mxu0 %vm1010_vm6, %v1983_v58 }
  0x2c   : > { %v1953_v17 = vpack.i.bf16 %v744_v14, %v735_v7  ;;  %v572_v18 = vmul.f32 %v1777_v10, %v2181_v2  ;;  %v573_v19 = vmul.f32 %v1778_v11, %v2181_v2  ;;  %vm2327_vm4 = vcmp.eq.s32.totalorder %v586_v15, 1  ;;  %v1984_v7 = vld [vmem:[%s2597_s3 + $0xc] sm:$0xff]  }
  0x2d   : > { %1949 = vrot.lane.b32.xlu0 %v1948_v4, %s2058_s18  ;;  %v1797_v23 = vunpack.c.l.bf16 %v1796_v20  ;;  %v1798_v24 = vunpack.c.h.bf16 %v1796_v20  ;;  %v717_v25 = vsel %vm594_vm1, %v709_v41, %v705_v43  ;;  %v2346_v29 = vsel %vm594_vm1, %v703_v3, %v707_v44 }
  0x2e   : > { %1944 = vrot.lane.b32.xlu1 %v1943_v8, %s2058_s18  ;;  %v581_v26 = vadd.f32 %v2196_v12, %v572_v18  ;;  %v582_v27 = vadd.f32 %v2196_v12, %v573_v19  ;;  %v2340_v28 = vsel %vm590_vm3, %v717_v25, 0.0  ;;  %v715_v32 = vsel %vm594_vm1, %v707_v44, %v703_v3  ;;  %v1989_v8 = vld [vmem:[%s2597_s3 + $0x20] ss:$0 sps:$4 sm:$0xff]  }
  0x2f   : > { %v884_v30 = vmul.f32 %v1797_v23, %v2181_v2  ;;  %v885_v31 = vmul.f32 %v1798_v24, %v2181_v2  ;;  %v706_v33 = vrot.slane %v2236_v37, 7  ;;  %v2357_v41 = vsel %vm590_vm3, %v715_v32, 0.0 }
  0x30   : > { %v583_v34 = vmax.f32 %v581_v26, 0.0  ;;  %v584_v35 = vmax.f32 %v582_v27, 0.0  ;;  %v710_v42 = vrot.slane %v2238_v38, 7  ;;  %v704_v36 = vrot.slane %v2240_v39, 7 }
  0x31   : > { %1954 = vrot.lane.b32.xlu0 %v1953_v17, %s2058_s18  ;;  %v893_v43 = vadd.f32 %v2196_v12, %v884_v30  ;;  %v894_v2 = vadd.f32 %v2196_v12, %v885_v31  ;;  %v708_v44 = vrot.slane %v2242_v40, 7  ;;  %vm899_vm5 = vcmp.eq.s32.totalorder %v898_v21, 1 }
  0x32   : > { %1959 = vrot.lane.b32.xlu1 %v1958_v13, %s2058_s18  ;;  %v588_v37 = vsel %vm2327_vm4, %v583_v34, 0.0  ;;  %v589_v45 = vsel %vm2327_vm4, %v584_v35, 0.0  ;;  %v2372_v38 = vsel %vm594_vm1, %v706_v33, %v710_v42  ;;  %v718_v46 = vsel %vm594_vm1, %v710_v42, %v706_v33 }
  0x33   : > { %v606_v12 = vrot.slane %v589_v45, 1  ;;  %v1963_v47 = vpack.i.bf16 %v589_v45, %v588_v37  ;;  %v605_v39 = vrot.slane %v588_v37, 1  ;;  %v895_v40 = vmax.f32 %v893_v43, 0.0 }
  0x34   : > { %v896_v48 = vmax.f32 %v894_v2, 0.0  ;;  %v2378_v49 = vsel %vm590_vm3, %v718_v46, 0.0  ;;  %v593_v50 = vrot.slane %v589_v45, 7  ;;  %v592_v51 = vrot.slane %v588_v37, 7 }
  0x35   : > { %1964 = vrot.lane.b32.xlu0 %v1963_v47, %s2057_s20  ;;  %v2383_v52 = vsel %vm594_vm1, %v704_v36, %v708_v44  ;;  %v716_v53 = vsel %vm594_vm1, %v708_v44, %v704_v36  ;;  %v608_v54 = vsel %vm607_vm0, %v605_v39, %v606_v12  ;;  %v609_v55 = vsel %vm607_vm0, %v606_v12, %v605_v39 }
  0x36   : > { %v900_v56 = vsel %vm899_vm5, %v895_v40, 0.0  ;;  %v901_v57 = vsel %vm899_vm5, %v896_v48, 0.0  ;;  %v615_v59 = vsel %vm604_vm2, %v609_v55, 0.0  ;;  %v2401_v5 = vsel %vm590_vm3, %v716_v53, 0.0 }
  0x37   : > { %v903_v60 = vrot.slane %v901_v57, 7  ;;  %v909_v61 = vrot.slane %v901_v57, 1  ;;  %v1973_v62 = vpack.i.bf16 %v901_v57, %v900_v56  ;;  %v1968_v0 = vpack.i.bf16 %v615_v59, %v608_v54 }
  0x38   : > { %v902_v3 = vrot.slane %v900_v56, 7  ;;  %v908_v4 = vrot.slane %v900_v56, 1  ;;  %v2412_v9 = vsel %vm594_vm1, %v592_v51, %v593_v50  ;;  %v596_v10 = vsel %vm594_vm1, %v593_v50, %v592_v51 }
  0x39   : > { %1974 = vrot.lane.b32.xlu0 %v1973_v62, %s2057_s20  ;;  %1969 = vrot.lane.b32.xlu1 %v1968_v0, %s2058_s18  ;;  %v2423_v14 = vsel %vm590_vm3, %v596_v10, 0.0  ;;  %v1012_v15 = vsel %vm1010_vm6, %v1983_v58, 0  ;;  %v2431_v18 = vsel %vm1010_vm6, %v1987_v63, 0  ;;  %v2444_v22 = vsel %vm1010_vm6, %v1989_v8, 0 }
  0x3a   : > { %v910_v11 = vsel %vm607_vm0, %v908_v4, %v909_v61  ;;  %v911_v13 = vsel %vm607_vm0, %v909_v61, %v908_v4  ;;  %1858 = vmatpush3.bf16.msra.mxu1 %v1012_v15  ;;  %v2435_v19 = vsel %vm594_vm1, %v902_v3, %v903_v60  ;;  %v905_v20 = vsel %vm594_vm1, %v903_v60, %v902_v3 }
  0x3b   : > { %v913_v17 = vsel %vm604_vm2, %v911_v13, 0.0  ;;  %1821 = vmatpush3.bf16.msra.mxu0 %v1012_v15  ;;  %1857 = vmatprep.subr.bf16.mxu1 %v1984_v7  ;;  %v2441_v6 = vsel %vm590_vm3, %v905_v20, 0.0 }
  0x3c   : > { %v1978_v21 = vpack.i.bf16 %v913_v17, %v910_v11  ;;  %1822 = vmatprep.subr.bf16.mxu0 %v1984_v7 }
  0x3e   : > { %1979 = vrot.lane.b32.xlu1 %v1978_v21, %s2058_s18  ;;  %1859 = vmatpush3.bf16.msra.mxu1 %v1984_v7 }
  0x3f   : > { %1823 = vmatpush3.bf16.msra.mxu0 %v1984_v7  ;;  %1862 = vmatprep.subr.msk.bf16.mxu1 %vm1010_vm6, %v1987_v63 }
  0x40   : > { %1863 = vmatprep.subr.msk.bf16.mxu0 %vm1010_vm6, %v1989_v8 }
  0x97   : > { %v1925_v23 = vpop.permute.xlu0 %1924 }
  0x98   : > { %v1935_v24 = vpop.permute.xlu1 %1934  ;;  %v1927_v26 = vunpack.i.h.bf16 %v1925_v23  ;;  %v1926_v27 = vunpack.i.l.bf16 %v1925_v23 }
  0x99   : > { %v1937_v32 = vunpack.i.h.bf16 %v1935_v24  ;;  %v1936_v33 = vunpack.i.l.bf16 %v1935_v24 }
  0x9a   : > { %v819_v35 = vsel %vm632_vm7, %v2340_v28, %v1926_v27  ;;  %v820_v42 = vsel %vm632_vm7, %v2321_v16, %v1927_v26  ;;  %v1991_v26 = vld [vmem:[%s2597_s3] sm:$0xff]  }
  0x9b   : > { %v1930_v25 = vpop.permute.xlu0 %1929  ;;  %v815_v56 = vsel %vm632_vm7, %v2357_v41, %v1936_v33  ;;  %v816_v57 = vsel %vm632_vm7, %v2346_v29, %v1937_v32 }
  0x9c   : > { %v1940_v1 = vpop.permute.xlu1 %1939  ;;  %v1932_v30 = vunpack.i.h.bf16 %v1930_v25  ;;  %v1931_v31 = vunpack.i.l.bf16 %v1930_v25 }
  0x9d   : > { %v1942_v12 = vunpack.i.h.bf16 %v1940_v1  ;;  %v1941_v47 = vunpack.i.l.bf16 %v1940_v1 }
  0x9e   : > { %v822_v44 = vsel %vm632_vm7, %v2372_v38, %v1932_v30  ;;  %v821_v37 = vsel %vm632_vm7, %v2378_v49, %v1931_v31 }
  0x9f   : > { %v1950_v34 = vpop.permute.xlu0 %1949  ;;  %v818_v60 = vsel %vm632_vm7, %v2383_v52, %v1942_v12  ;;  %v817_v61 = vsel %vm632_vm7, %v2401_v5, %v1941_v47 }
  0xa0   : > { %v1952_v43 = vunpack.i.h.bf16 %v1950_v34  ;;  %v1951_v2 = vunpack.i.l.bf16 %v1950_v34  ;;  %v1945_v36 = vpop.permute.xlu1 %1944 }
  0xa1   : > { %v1947_v45 = vunpack.i.h.bf16 %v1945_v36  ;;  %v1946_v46 = vunpack.i.l.bf16 %v1945_v36 }
  0xa2   : > { %v829_v39 = vsel %vm635_vm8, %v821_v37, %v1951_v2  ;;  %v830_v28 = vsel %vm635_vm8, %v822_v44, %v1952_v43 }
  0xa3   : > { %v1763_v40 = vpack.c.bf16 %v829_v39, %v829_v39  ;;  %v1764_v48 = vpack.c.bf16 %v830_v28, %v830_v28  ;;  %v828_v16 = vsel %vm635_vm8, %v820_v42, %v1947_v45  ;;  %v827_v50 = vsel %vm635_vm8, %v819_v35, %v1946_v46  ;;  %v1955_v51 = vpop.permute.xlu0 %1954 }
  0xa4   : > { %v1762_v53 = vpack.c.bf16 %v828_v16, %v828_v16  ;;  %v1761_v38 = vpack.c.bf16 %v827_v50, %v827_v50  ;;  %v1960_v54 = vpop.permute.xlu1 %1959  ;;  %v1957_v55 = vunpack.i.h.bf16 %v1955_v51  ;;  %v1956_v49 = vunpack.i.l.bf16 %v1955_v51 }
  0xa5   : > { %870 = vst.msk [vmem:[#allocation2 + $0x20] sm:$0xf] %vm646_vm9, %v1763_v40  ;;  %871 = vst.msk [vmem:[#allocation2 + $0x24] sm:$0xf] %vm646_vm9, %v1764_v48  ;;  %v1962_v58 = vunpack.i.h.bf16 %v1960_v54  ;;  %v1961_v59 = vunpack.i.l.bf16 %v1960_v54 }
  0xa6   : > { %869 = vst.msk [vmem:[#allocation2 + $0x1c] sm:$0xf] %vm646_vm9, %v1762_v53  ;;  %868 = vst.msk [vmem:[#allocation2 + $0x18] sm:$0xf] %vm646_vm9, %v1761_v38  ;;  %v823_v41 = vsel %vm635_vm8, %v815_v56, %v1956_v49  ;;  %v824_v29 = vsel %vm635_vm8, %v816_v57, %v1957_v55  ;;  %v2520_v57 = vld [vmem:[%s2598_s4] ss:$0 sm:$0xff] }
  0xa7   : > { %v825_v62 = vsel %vm635_vm8, %v817_v61, %v1961_v59  ;;  %v826_v63 = vsel %vm635_vm8, %v818_v60, %v1962_v58  ;;  %v1757_v0 = vpack.c.bf16 %v823_v41, %v823_v41  ;;  %v1758_v3 = vpack.c.bf16 %v824_v29, %v824_v29  ;;  %v1965_v4 = vpop.permute.xlu0 %1964 }
  0xa8   : > { %v1759_v7 = vpack.c.bf16 %v825_v62, %v825_v62  ;;  %v1760_v52 = vpack.c.bf16 %v826_v63, %v826_v63  ;;  %v1967_v8 = vunpack.i.h.bf16 %v1965_v4  ;;  %v1966_v10 = vunpack.i.l.bf16 %v1965_v4 }
  0xa9   : > { %864 = vst.msk [vmem:[#allocation2 + $0x8] sm:$0xf] %vm646_vm9, %v1757_v0  ;;  %865 = vst.msk [vmem:[#allocation2 + $0xc] sm:$0xf] %vm646_vm9, %v1758_v3 }
  0xaa   : > { %866 = vst.msk [vmem:[#allocation2 + $0x10] sm:$0xf] %vm646_vm9, %v1759_v7  ;;  %867 = vst.msk [vmem:[#allocation2 + $0x14] sm:$0xf] %vm646_vm9, %v1760_v52  ;;  %v633_v11 = vsel %vm632_vm7, %v2423_v14, %v1966_v10  ;;  %v634_v13 = vsel %vm632_vm7, %v2412_v9, %v1967_v8  ;;  %v1993_v9 = vld [vmem:[%s2597_s3 + $0x18] sm:$0xff]  }
  0xab   : > { %v1975_v5 = vpop.permute.xlu0 %1974  ;;  %v1970_v15 = vpop.permute.xlu1 %1969 }
  0xac   : > { %v1986_v17 = vld [vmem:[#allocation2 + $0x20] sm:$0xff]   ;;  %v1977_v20 = vunpack.i.h.bf16 %v1975_v5  ;;  %v1976_v21 = vunpack.i.l.bf16 %v1975_v5  ;;  %v1972_v23 = vunpack.i.h.bf16 %v1970_v15  ;;  %v1971_v24 = vunpack.i.l.bf16 %v1970_v15 }
  0xad   : > { %v1985_v25 = vld [vmem:[#allocation2 + $0x18] sm:$0xff]   ;;  %v1998_v46 = vld [vmem:[#allocation2 + $0x20] sm:$0xff]  }
  0xae   : > { %v636_v27 = vsel %vm635_vm8, %v633_v11, %v1971_v24  ;;  %v637_v1 = vsel %vm635_vm8, %v634_v13, %v1972_v23  ;;  %1828 = vmatprep.mubr.msk.bf16.mxu1 %vm997_vm10, %v1985_v25  ;;  %v931_v32 = vsel %vm632_vm7, %v2435_v19, %v1977_v20  ;;  %v930_v33 = vsel %vm632_vm7, %v2441_v6, %v1976_v21  ;;  %v1997_v44 = vld [vmem:[#allocation2 + $0x18] sm:$0xff]  }
  0xaf   : > { %v1755_v14 = vpack.c.bf16 %v636_v27, %v636_v27  ;;  %v1756_v30 = vpack.c.bf16 %v637_v1, %v637_v1  ;;  %1829 = vmatmul.mubr.msk.bf16.vlgmr.msra.gmra.mxu1 %vm997_vm10, %v1986_v17  ;;  %v1999_v47 = vld [vmem:[#allocation2 + $0x18] sm:$0xff]  }
  0xb0   : > { %v1988_v31 = vld [vmem:[#allocation2 + $0x8] sm:$0xff]   ;;  %v1980_v34 = vpop.permute.xlu1 %1979  ;;  %1833 = vmatpush3.bf16.msra.mxu1 %v2431_v18 }
  0xb1   : > { %v1990_v35 = vld [vmem:[#allocation2 + $0x10] sm:$0xff]   ;;  %v1982_v42 = vunpack.i.h.bf16 %v1980_v34  ;;  %v1981_v43 = vunpack.i.l.bf16 %v1980_v34  ;;  %647 = vst.msk [vmem:[#allocation2] sm:$0xf] %vm646_vm9, %v1755_v14  ;;  %648 = vst.msk [vmem:[#allocation2 + $0x4] sm:$0xf] %vm646_vm9, %v1756_v30  ;;  %1824 = vmatprep.mubr.msk.bf16.mxu0 %vm997_vm10, %v1988_v31  ;;  %1834 = vmatprep.subr.bf16.mxu1 %v1991_v26  ;;  %v1995_v45 = vld [vmem:[#allocation2 + $0x8] sm:$0xff]  }
  0xb2   : > { %v1992_v2 = vld [vmem:[#allocation2 + $0x10] sm:$0xff]   ;;  %1825 = vmatmul.mubr.msk.bf16.vlgmr.msra.gmra.mxu0 %vm997_vm10, %v1990_v35 }
  0xb3   : > { %v933_v19 = vsel %vm635_vm8, %v931_v32, %v1982_v42  ;;  %v932_v6 = vsel %vm635_vm8, %v930_v33, %v1981_v43  ;;  %1845 = vmatpush3.bf16.msra.mxu0 %v2444_v22  ;;  %1848 = vmatprep.mubr.msk.bf16.mxu0 %vm997_vm10, %v1992_v2  ;;  %v1996_v12 = vld [vmem:[#allocation2 + $0x10] sm:$0xff]  }
  0xb4   : > { %v1766_v18 = vpack.c.bf16 %v933_v19, %v933_v19  ;;  %v1765_v36 = vpack.c.bf16 %v932_v6, %v932_v6  ;;  %1835 = vmatpush3.bf16.msra.mxu1 %v1991_v26  ;;  %1846 = vmatprep.subr.bf16.mxu0 %v1993_v9 }
  0xb6   : > { %944 = vst.msk [vmem:[#allocation2 + $0x2c] sm:$0xf] %vm646_vm9, %v1766_v18  ;;  %943 = vst.msk [vmem:[#allocation2 + $0x28] sm:$0xf] %vm646_vm9, %v1765_v36 }
  0xb7   : > { %1847 = vmatpush3.bf16.msra.mxu0 %v1993_v9 }
  0xb8   : > { %v1994_v37 = vld [vmem:[#allocation2] sm:$0xff]  }
  0xb9   : > { %1836 = vmatprep.mubr.msk.bf16.mxu1 %vm997_vm10, %v1994_v37 }
  0xba   : > { %1849 = vmatmul.mubr.msk.bf16.vlgmr.msra.gmra.mxu0 %vm997_vm10, %v1997_v44  ;;  %1837 = vmatmul.mubr.msk.bf16.vlgmr.msra.gmra.mxu1 %vm997_vm10, %v1995_v45 }
  0xbb   : > { %1852 = vmatprep.mubr.msk.bf16.mxu0 %vm997_vm10, %v1998_v46  ;;  %1840 = vmatprep.mubr.msk.bf16.mxu1 %vm997_vm10, %v1996_v12 }
  0xbd   : > { %v2000_v22 = vld [vmem:[#allocation2 + $0x28] sm:$0xff]  }
  0xc2   : > { %1853 = vmatmul.mubr.msk.bf16.gmra.mxu0 %vm997_vm10, %v2000_v22  ;;  %1841 = vmatmul.mubr.msk.bf16.gmra.mxu1 %vm997_vm10, %v1999_v47 }
 0x16f   : > { %v1830_v39 = vpop.f32.mrf.mxu1 }
 0x171   : > { %v1064_v28 = vpop.f32.mrf.mxu1 }
 0x172   : > { %v1826_v40 = vpop.f32.mrf.mxu0 }
 0x173   : > { %v1831_v48 = vpop.f32.mrf.mxu1 }
 0x174   : > { %v1048_v16 = vpop.f32.mrf.mxu0 }
 0x175   : > { %v1067_v51 = vpop.f32.mrf.mxu1 }
 0x176   : > { %v1827_v50 = vpop.f32.mrf.mxu0 }
 0x178   : > { %v1051_v53 = vpop.f32.mrf.mxu0 }
 0x17a   : > { %v1850_v38 = vpop.f32.mrf.mxu0  ;;  %v1838_v54 = vpop.f32.mrf.mxu1 }
 0x17b   : > { %v1166_v55 = vadd.f32 %v1838_v54, %v1826_v40 }
 0x17c   : > { %v1279_v49 = vpop.f32.mrf.mxu0  ;;  %v1157_v56 = vpop.f32.mrf.mxu1 }
 0x17d   : > { %v1158_v58 = vadd.f32 %v1157_v56, %v1048_v16  ;;  %v1312_v59 = vadd.f32 %v1850_v38, %v1166_v55 }
 0x17e   : > { %v1851_v60 = vpop.f32.mrf.mxu0  ;;  %v1839_v61 = vpop.f32.mrf.mxu1 }
 0x17f   : > { %v1327_v41 = vadd.f32 %v2520_v57, %v1312_v59  ;;  %v1169_v29 = vadd.f32 %v1839_v61, %v1827_v50  ;;  %v1310_v62 = vadd.f32 %v1279_v49, %v1158_v58 }
 0x180   : > { %v1282_v63 = vpop.f32.mrf.mxu0  ;;  %v1160_v0 = vpop.f32.mrf.mxu1 }
 0x181   : > { %v1769_v3 = vpack.c.bf16 %v1327_v41, %v1327_v41  ;;  %v1325_v4 = vadd.f32 %v2520_v57, %v1310_v62  ;;  %v1161_v52 = vadd.f32 %v1160_v0, %v1051_v53  ;;  %v1313_v8 = vadd.f32 %v1851_v60, %v1169_v29 }
 0x182   : > { %v1854_v7 = vpop.f32.mrf.mxu0  ;;  %v1842_v10 = vpop.f32.mrf.mxu1  ;;  %v1377_v23 = vsel %vm632_vm7, %v1327_v41, 0.0  ;;  %v1397_v9 = vmul.f32 %v1327_v41, %v1327_v41 }
 0x183   : > { %1368 = vst.msk [vmem:[%s2528_s24 + $0x8] sm:$0xf] %vm1365_vm11, %v1769_v3  ;;  %v1767_v5 = vpack.c.bf16 %v1325_v4, %v1325_v4  ;;  %v1328_v13 = vadd.f32 %v2520_v57, %v1313_v8  ;;  %v1182_v15 = vadd.f32 %v1842_v10, %v1830_v39  ;;  %v1311_v17 = vadd.f32 %v1282_v63, %v1161_v52 }
 0x184   : > { %v1295_v11 = vpop.f32.mrf.mxu0  ;;  %v1173_v20 = vpop.f32.mrf.mxu1  ;;  %v1395_v24 = vmul.f32 %v1325_v4, %v1325_v4  ;;  %v1374_v32 = vsel %vm632_vm7, %v1325_v4, 0.0  ;;  %v1406_v47 = vsel %vm632_vm7, %v1397_v9, 0.0 }
 0x185   : > { %1366 = vst.msk [vmem:[%s2528_s24] sm:$0xf] %vm1365_vm11, %v1767_v5  ;;  %v1174_v21 = vadd.f32 %v1173_v20, %v1064_v28  ;;  %v1770_v25 = vpack.c.bf16 %v1328_v13, %v1328_v13  ;;  %v1326_v26 = vadd.f32 %v2520_v57, %v1311_v17  ;;  %v1316_v14 = vadd.f32 %v1854_v7, %v1182_v15 }
 0x186   : > { %v1843_v27 = vpop.f32.mrf.mxu1  ;;  %v1855_v1 = vpop.f32.mrf.mxu0  ;;  %v1403_v18 = vsel %vm632_vm7, %v1395_v24, 0.0  ;;  %v1398_v36 = vmul.f32 %v1328_v13, %v1328_v13  ;;  %v1379_v39 = vsel %vm632_vm7, %v1328_v13, 0.0 }
 0x187   : > { %v1185_v30 = vadd.f32 %v1843_v27, %v1831_v48  ;;  %v1314_v31 = vadd.f32 %v1295_v11, %v1174_v21  ;;  %1369 = vst.msk [vmem:[%s2528_s24 + $0xc] sm:$0xf] %vm1365_vm11, %v1770_v25  ;;  %v1768_v33 = vpack.c.bf16 %v1326_v26, %v1326_v26  ;;  %v1375_v34 = vsel %vm632_vm7, %v1326_v26, 0.0 }
 0x188   : > { %v1396_v35 = vmul.f32 %v1326_v26, %v1326_v26  ;;  %v1176_v42 = vpop.f32.mrf.mxu1  ;;  %v1376_v43 = vadd.f32 %v1375_v34, %v1374_v32  ;;  %v1331_v2 = vadd.f32 %v2520_v57, %v1316_v14  ;;  %v1298_v45 = vpop.f32.mrf.mxu0  ;;  %v1408_v53 = vsel %vm632_vm7, %v1398_v36, 0.0 }
 0x189   : > { %v1329_v19 = vadd.f32 %v2520_v57, %v1314_v31  ;;  %v1177_v6 = vadd.f32 %v1176_v42, %v1067_v51  ;;  %1367 = vst.msk [vmem:[%s2528_s24 + $0x4] sm:$0xf] %vm1365_vm11, %v1768_v33  ;;  %v1317_v37 = vadd.f32 %v1855_v1, %v1185_v30 }
 0x18a   : > { %v1404_v44 = vsel %vm632_vm7, %v1396_v35, 0.0  ;;  %v1378_v46 = vadd.f32 %v1377_v23, %v1376_v43  ;;  %v1773_v22 = vpack.c.bf16 %v1331_v2, %v1331_v2  ;;  %v1401_v60 = vmul.f32 %v1331_v2, %v1331_v2 }
 0x18b   : > { %v1405_v12 = vadd.f32 %v1404_v44, %v1403_v18  ;;  %v1771_v28 = vpack.c.bf16 %v1329_v19, %v1329_v19  ;;  %v1399_v40 = vmul.f32 %v1329_v19, %v1329_v19  ;;  %v1332_v50 = vadd.f32 %v2520_v57, %v1317_v37 }
 0x18c   : > { %1372 = vst.msk [vmem:[%s2528_s24 + $0x18] sm:$0xf] %vm1365_vm11, %v1773_v22  ;;  %v1380_v16 = vadd.f32 %v1379_v39, %v1378_v46  ;;  %v1315_v51 = vadd.f32 %v1298_v45, %v1177_v6  ;;  %v1381_v38 = vsel %vm632_vm7, %v1329_v19, 0.0  ;;  %v1385_v63 = vsel %vm632_vm7, %v1331_v2, 0.0 }
 0x18d   : > { %v1407_v48 = vadd.f32 %v1406_v47, %v1405_v12  ;;  %1370 = vst.msk [vmem:[%s2528_s24 + $0x10] sm:$0xf] %vm1365_vm11, %v1771_v28  ;;  %v1774_v49 = vpack.c.bf16 %v1332_v50, %v1332_v50  ;;  %v1410_v56 = vsel %vm632_vm7, %v1399_v40, 0.0  ;;  %v1402_v0 = vmul.f32 %v1332_v50, %v1332_v50 }
 0x18e   : > { %v1382_v54 = vadd.f32 %v1381_v38, %v1380_v16  ;;  %v1330_v58 = vadd.f32 %v2520_v57, %v1315_v51  ;;  %v1414_v57 = vsel %vm632_vm7, %v1401_v60, 0.0  ;;  %v1387_v52 = vsel %vm632_vm7, %v1332_v50, 0.0 }
 0x18f   : > { %v1409_v55 = vadd.f32 %v1408_v53, %v1407_v48  ;;  %1373 = vst.msk [vmem:[%s2528_s24 + $0x1c] sm:$0xf] %vm1365_vm11, %v1774_v49  ;;  %v1416_v5 = vsel %vm632_vm7, %v1402_v0, 0.0 }
 0x190   : > { %v1772_v61 = vpack.c.bf16 %v1330_v58, %v1330_v58  ;;  %v1383_v41 = vsel %vm632_vm7, %v1330_v58, 0.0  ;;  %v1400_v29 = vmul.f32 %v1330_v58, %v1330_v58 }
 0x191   : > { %v1411_v59 = vadd.f32 %v1410_v56, %v1409_v55  ;;  %v1384_v62 = vadd.f32 %v1383_v41, %v1382_v54 }
 0x192   : > { %1371 = vst.msk [vmem:[%s2528_s24 + $0x14] sm:$0xf] %vm1365_vm11, %v1772_v61  ;;  %v1412_v3 = vsel %vm632_vm7, %v1400_v29, 0.0 }
 0x193   : > { %v1386_v4 = vadd.f32 %v1385_v63, %v1384_v62  ;;  %v1413_v7 = vadd.f32 %v1412_v3, %v1411_v59 }
 0x195   : > { %v1388_v8 = vadd.f32 %v1387_v52, %v1386_v4  ;;  %v1415_v10 = vadd.f32 %v1414_v57, %v1413_v7 }
 0x197   : > { %v1389_v11 = vrot.slane %v1388_v8, 4  ;;  %v1417_v13 = vadd.f32 %v1416_v5, %v1415_v10 }
 0x199   : > { %v1390_v15 = vadd.f32 %v1389_v11, %v1388_v8  ;;  %v1418_v17 = vrot.slane %v1417_v13, 4 }
 0x19b   : > { %v1391_v20 = vrot.slane %v1390_v15, 2  ;;  %v1419_v21 = vadd.f32 %v1418_v17, %v1417_v13 }
 0x19d   : > { %v1392_v23 = vadd.f32 %v1391_v20, %v1390_v15  ;;  %v1420_v24 = vrot.slane %v1419_v21, 2 }
 0x19f   : > { %v1393_v25 = vrot.slane %v1392_v23, 1  ;;  %v1421_v26 = vadd.f32 %v1420_v24, %v1419_v21 }
 0x1a1   : > { %v1422_v27 = vrot.slane %v1421_v26, 1  ;;  %v1394_v1 = vadd.f32 %v1393_v25, %v1392_v23  ;;  %1429 = sbr.rel (%p1750_p0) target bundleno = 424 (0x1a8), region = 52 }
 0x1a3   : > { %v1423_v9 = vadd.f32 %v1422_v27, %v1421_v26 }
 0x1a5   : > { %v1425_v14 = vsel %vm1424_vm12, %v1394_v1, %v1423_v9 }
 0x1a6   : > { %vm1430_vm13 = vcmask 58368   ;;  %v2059_v30 = vmov 0.0  }
 0x1a7   : > { %1431 = vst.msk [vmem:[%s2186_s21] sm:$0x3] %vm1430_vm13, %v2059_v30 }
 0x1a8 PF: > { %vm1434_vm14 = vcmask 58368  }
 0x1ae   : > { %v1432_v31 = vld [vmem:[%s2186_s21] sm:$0x3] }
 0x1af   : > { %v1433_v32 = vadd.f32 %v1432_v31, %v1425_v14 }
 0x1b1   : > { %1435 = vst.msk [vmem:[%s2186_s21] sm:$0x3] %vm1434_vm14, %v1433_v32 }
 0x1b2 PF: > { %s19_s11 = sadd.s32 1, %s2055_s11   ;;  %s2611_s29 = sld [smem:[#allocation3_spill]] }
 0x1b3   : > { %p16_p1 = scmp.ge.s32.totalorder %s19_s11, 10   ;;  %s2612_s23 = sld [smem:[#allocation4_spill]] }
 0x1b4   : > { %s2613_s25 = sld [smem:[#allocation5_spill]]  ;;  %s2615_s27 = smov %s2043_s30 }
 0x1b5   : > { %s2614_s10 = sld [smem:[#allocation6_spill]]  ;;  %s2616_s28 = smov %s2047_s9 }
 0x1b6   :  { %18 = sbr.rel (!%p16_p1) target bundleno = 4 (0x4), region = 105 }
 0x1b9   : > { %s2617_s30 = smov %s2612_s23 }
 0x1ba   : > { %s2618_s9 = smov %s2613_s25 }

</bundles_post_ra>
